<compile_context>
chip_gen: v5e
topology: v5e:2x2
jax: 0.10.0
libtpu: 0.0.40
codegen_flags: <defaults>
</compile_context>

<pallas_src>
import math

import jax
import jax.numpy as jnp
from jax.experimental import pallas as pl
from jax.experimental.pallas import tpu as pltpu

NUM_HEADS = 8          # fixed by TFBackbone.__init__
LEAKY_SLOPE = 0.01     # torch.nn.functional.leaky_relu default
LN_EPS = 1e-5          # nn.LayerNorm default


# ----------------------------------------------------------------------------
# Deterministic parameter / positional-encoding construction (plain JAX glue)
# ----------------------------------------------------------------------------
def create_2d_positional_embedding(img_height, img_width, d_model):
    assert d_model % 2 == 0, "d_model should be even"
    y, x = jnp.meshgrid(jnp.arange(img_height), jnp.arange(img_width), indexing="ij")
    y = y.reshape(-1).astype(jnp.float32)
    x = x.reshape(-1).astype(jnp.float32)
    # TODO(synk): the PyTorch reference divides by (dim - 1), which is 0/0 = NaN when
    # a dimension equals 1 (TimeSeriesPosEmbedding uses img_height=1); guarded here.
    y = y / max(img_height - 1, 1) * 2 - 1
    x = x / max(img_width - 1, 1) * 2 - 1
    half = d_model // 2
    div_term = jnp.exp(jnp.arange(half, dtype=jnp.float32) * (-math.log(10000.0) / half))
    pos_y = jnp.outer(y, div_term)
    pos_x = jnp.outer(x, div_term)
    pe = jnp.zeros((img_height * img_width, d_model), jnp.float32)
    pe = pe.at[:, 0::2].set(jnp.sin(pos_y))
    pe = pe.at[:, 1::2].set(jnp.cos(pos_x))
    return pe.reshape(img_height, img_width, d_model)


def init_params(key, d_model, num_layers, ff_dim):
    # TODO(synk): weight convention is x @ W with wqkv of shape (D, 3D); loading real
    # torch nn.MultiheadAttention weights would require a transpose.
    layers = []
    for i in range(num_layers):
        ks = jax.random.split(jax.random.fold_in(key, i), 4)
        layers.append(dict(
            wqkv=0.02 * jax.random.normal(ks[0], (d_model, 3 * d_model), jnp.float32),
            bqkv=jnp.zeros((1, 3 * d_model), jnp.float32),
            wo=0.02 * jax.random.normal(ks[1], (d_model, d_model), jnp.float32),
            bo=jnp.zeros((1, d_model), jnp.float32),
            ln1_g=jnp.ones((1, d_model), jnp.float32),
            ln1_b=jnp.zeros((1, d_model), jnp.float32),
            w1=0.02 * jax.random.normal(ks[2], (d_model, ff_dim), jnp.float32),
            b1=jnp.zeros((1, ff_dim), jnp.float32),
            w2=0.02 * jax.random.normal(ks[3], (ff_dim, d_model), jnp.float32),
            b2=jnp.zeros((1, d_model), jnp.float32),
            ln2_g=jnp.ones((1, d_model), jnp.float32),
            ln2_b=jnp.zeros((1, d_model), jnp.float32),
        ))
    return layers


# ----------------------------------------------------------------------------
# Pallas encoder-layer kernel (attention + out-proj + LN + FFN + LN per q-tile)
# ----------------------------------------------------------------------------
def _layer_norm(x, g, b):
    mu = jnp.mean(x, axis=-1, keepdims=True)
    var = jnp.mean(jnp.square(x - mu), axis=-1, keepdims=True)
    return (x - mu) * jax.lax.rsqrt(var + LN_EPS) * g + b


def _encoder_layer_kernel(x_ref, q_ref, kt_ref, v_ref, wo_ref, bo_ref,
                          g1_ref, beta1_ref, w1_ref, b1_ref,
                          w2_ref, b2_ref, g2_ref, beta2_ref, o_ref):
    # Post-norm nn.TransformerEncoderLayer (batch_first, activation=leaky_relu).
    # TODO(synk): dropout(p=0.1) of the PyTorch layer is train-mode only; eval
    # semantics (dropout = identity) are implemented here.
    f32 = jnp.float32
    bf16 = jnp.bfloat16

    x_tile = x_ref[0]                                     # (tq, D) f32

    # ---- attention, one head at a time: only one (tq, S) score/prob tile live
    # TODO(synk): for very long sequences a flash-style K-tiled online softmax
    # would bound this to (tq, tk); not needed at the shapes exercised here.
    ctx_parts = []
    for h in range(NUM_HEADS):
        q_h = q_ref[0, h]                                  # (tq, hd) bf16, pre-scaled
        kt_h = kt_ref[0, h]                                # (hd, S)  bf16
        v_h = v_ref[0, h]                                  # (S, hd)  bf16
        s_h = jnp.dot(q_h, kt_h, preferred_element_type=f32)        # (tq, S)
        s_h = s_h - jnp.max(s_h, axis=-1, keepdims=True)
        p_h = jnp.exp(s_h)
        p_h = p_h * pl.reciprocal(jnp.sum(p_h, axis=-1, keepdims=True), approx=True)
        ctx_parts.append(jnp.dot(p_h.astype(bf16), v_h,
                                 preferred_element_type=f32))        # (tq, hd)
    ctx = jnp.concatenate(ctx_parts, axis=-1)              # (tq, D) f32

    # Output projection: single K=D matmul (head-sum fused into the layout).
    attn = jnp.dot(ctx.astype(bf16), wo_ref[...],
                   preferred_element_type=f32) + bo_ref[...]         # (tq, D)

    y1 = _layer_norm(x_tile + attn, g1_ref[...], beta1_ref[...])

    # ---- feed-forward ----
    h1 = jnp.dot(y1.astype(bf16), w1_ref[...],
                 preferred_element_type=f32) + b1_ref[...]
    h1 = jnp.where(h1 >= 0, h1, LEAKY_SLOPE * h1)           # leaky_relu
    ffo = jnp.dot(h1.astype(bf16), w2_ref[...],
                  preferred_element_type=f32) + b2_ref[...]
    o_ref[0] = _layer_norm(y1 + ffo, g2_ref[...], beta2_ref[...]).astype(o_ref.dtype)


# ----------------------------------------------------------------------------
# Tiling / VMEM accounting (lane- & sublane-padding aware, generation aware)
# ----------------------------------------------------------------------------
def _rup(x, m):
    return ((x + m - 1) // m) * m


def _vmem_capacity_bytes():
    try:
        return int(pltpu.get_tpu_info().vmem_capacity_bytes)
    except Exception:
        return 64 << 20   # conservative (v7x per-core physical VMEM)


def _vmem_estimate(S, tq, D, ff, hd):
    """Rough VMEM footprint in bytes, including lane/sublane padding."""
    H = NUM_HEADS
    n = 0
    # double-buffered pipelined blocks
    n += 2 * _rup(tq, 8) * _rup(D, 128) * 4                  # x block (f32)
    n += 2 * _rup(tq, 8) * _rup(D, 128) * 4                  # out block (f32)
    n += 2 * H * _rup(tq, 16) * _rup(hd, 128) * 2            # Q block (bf16)
    n += 2 * H * _rup(hd, 16) * _rup(S, 128) * 2             # K^T block (bf16)
    n += 2 * H * _rup(S, 16) * _rup(hd, 128) * 2             # V block (bf16)
    # constant-index weight blocks (still double-buffered by the pipeliner)
    n += 2 * (_rup(D, 16) * _rup(D, 128)
              + _rup(D, 16) * _rup(ff, 128)
              + _rup(ff, 16) * _rup(D, 128)) * 2              # wo, w1, w2 (bf16)
    n += 2 * 6 * 8 * _rup(D, 128) * 4                         # (1, D) f32 params
    n += 2 * 1 * 8 * _rup(ff, 128) * 4                        # b1
    # live intermediates in the kernel body
    n += 3 * _rup(tq, 8) * _rup(S, 128) * 4                   # per-head scores/probs
    n += 3 * _rup(tq, 8) * _rup(D, 128) * 4                   # ctx / attn / y1
    n += 2 * _rup(tq, 8) * _rup(ff, 128) * 4                  # FFN hidden
    return n


def _pick_q_tile(S, D, ff, hd, budget):
    """Pick tq: full S for short sequences; otherwise an MXU-friendly tile
    (multiple of 128) whose estimated footprint fits the VMEM budget."""
    if S <= 512 and _vmem_estimate(S, S, D, ff, hd) <= budget:
        return S
    for tq in (512, 384, 256, 128):
        if tq < S and _vmem_estimate(S, tq, D, ff, hd) <= budget:
            return tq
    return min(S, 128)


# ----------------------------------------------------------------------------
# Per-layer wrapper: XLA QKV projection (hoisted) + Pallas tile kernel
# ----------------------------------------------------------------------------
def encoder_layer(x, lp):
    B, S, D = x.shape
    assert D % NUM_HEADS == 0, "d_model must be divisible by num_heads"
    hd = D // NUM_HEADS
    ff = lp["w1"].shape[1]
    bf16 = jnp.bfloat16

    capacity = _vmem_capacity_bytes()
    budget = int(0.85 * capacity)                 # headroom for Mosaic internals
    tq = _pick_q_tile(S, D, ff, hd, budget)
    Sq = _rup(S, tq)
    nq = Sq // tq

    # Fused QKV projection + head-major layout, hoisted out of the tile loop
    # (plain XLA matmul/transpose glue; keeps per-grid-step work uniform).
    scale = 1.0 / math.sqrt(hd)
    qkv = jnp.einsum("bsd,de->bse", x.astype(bf16), lp["wqkv"].astype(bf16),
                     preferred_element_type=jnp.float32) + lp["bqkv"]
    q_p, k_p, v_p = jnp.split(qkv, 3, axis=-1)
    q_p = (q_p * scale).reshape(B, S, NUM_HEADS, hd).transpose(0, 2, 1, 3).astype(bf16)  # (B,H,S,hd)
    kt_p = k_p.reshape(B, S, NUM_HEADS, hd).transpose(0, 2, 3, 1).astype(bf16)           # (B,H,hd,S)
    v_p = v_p.reshape(B, S, NUM_HEADS, hd).transpose(0, 2, 1, 3).astype(bf16)            # (B,H,S,hd)

    # Query-side padding only (keys/values keep true S -> softmax unchanged).
    x_in = x
    if Sq != S:
        pad = Sq - S
        x_in = jnp.pad(x, ((0, 0), (0, pad), (0, 0)))
        q_p = jnp.pad(q_p, ((0, 0), (0, 0), (0, pad), (0, 0)))

    args = (x_in, q_p, kt_p, v_p,
            lp["wo"].astype(bf16), lp["bo"], lp["ln1_g"], lp["ln1_b"],
            lp["w1"].astype(bf16), lp["b1"], lp["w2"].astype(bf16), lp["b2"],
            lp["ln2_g"], lp["ln2_b"])

    def _const_map(rank):
        zeros = (0,) * rank
        return lambda b, q, _z=zeros: _z

    in_specs = [
        pl.BlockSpec((1, tq, D), lambda b, q: (b, q, 0)),                  # x
        pl.BlockSpec((1, NUM_HEADS, tq, hd), lambda b, q: (b, 0, q, 0)),   # Q
        pl.BlockSpec((1, NUM_HEADS, hd, S), lambda b, q: (b, 0, 0, 0)),    # K^T
        pl.BlockSpec((1, NUM_HEADS, S, hd), lambda b, q: (b, 0, 0, 0)),    # V
    ]
    for a in args[4:]:
        in_specs.append(pl.BlockSpec(a.shape, _const_map(a.ndim)))

    need = _vmem_estimate(S, tq, D, ff, hd)
    vmem_limit = max(32 << 20, min(int(1.5 * need) + (4 << 20), budget))

    out = pl.pallas_call(
        _encoder_layer_kernel,
        out_shape=jax.ShapeDtypeStruct((B, Sq, D), jnp.float32),
        grid=(B, nq),
        in_specs=in_specs,
        out_specs=pl.BlockSpec((1, tq, D), lambda b, q: (b, q, 0)),
        compiler_params=pltpu.CompilerParams(
            dimension_semantics=("parallel", "parallel"),
            vmem_limit_bytes=vmem_limit),
    )(*args)

    return out[:, :S, :] if Sq != S else out


# ----------------------------------------------------------------------------
# Forward pass of TFBackbone
# ----------------------------------------------------------------------------
def tf_backbone_forward(encoded_img, layer_params, *, frame_num, input_height,
                        input_weight, output_height, output_weight, d_model,
                        pad_unk=True):
    B, T, H, W, C = encoded_img.shape
    assert (T, H, W, C) == (frame_num, input_height, input_weight, d_model)
    assert d_model % NUM_HEADS == 0

    # TimeSeriesPosEmbedding: create(1, T, C) -> (1,T,1,1,C), flipped along T
    ts_pe = create_2d_positional_embedding(1, frame_num, d_model).reshape(frame_num, d_model)[::-1]
    # ImgPosEmbedding (input): (1,1,H,W,C)
    img_pe = create_2d_positional_embedding(input_height, input_weight, d_model)
    # ImgPosEmbedding (output layer): negated
    out_pe = -create_2d_positional_embedding(output_height, output_weight, d_model)
    # PadUnk tokens
    pad_tok = create_2d_positional_embedding(output_height, output_weight, d_model).reshape(
        output_height * output_weight, d_model)

    # Prologue: additive positional encodings + pad-unk concat (cheap XLA glue).
    pos = (ts_pe[:, None, None, :] + img_pe[None]).reshape(
        frame_num * input_height * input_weight, d_model)
    x_tok = encoded_img.reshape(B, -1, d_model) + pos[None]
    if pad_unk:
        x_tok = jnp.concatenate(
            [x_tok, jnp.broadcast_to(pad_tok[None], (B, pad_tok.shape[0], d_model))], axis=1)

    for lp in layer_params:                      # Pallas transformer layers
        x_tok = encoder_layer(x_tok, lp)

    # Epilogue: slice the output tokens and add the (negated) output pos-embed.
    Lo = output_height * output_weight
    out = x_tok[:, -Lo:, :] + out_pe.reshape(Lo, d_model)[None]
    return out.reshape(B, output_height, output_weight, d_model)


# ----------------------------------------------------------------------------
if __name__ == "__main__":
    # small-shape config consistent with TFBackbone (d_model divisible by 8 heads)
    B, T, H, W = 2, 2, 2, 2
    OH, OW = 2, 2
    D = 128
    NUM_LAYERS = 2
    FF = 2 * D

    key = jax.random.PRNGKey(0)
    x = jax.random.normal(key, (B, T, H, W, D), jnp.float32)
    params = init_params(key, D, NUM_LAYERS, FF)

    out = tf_backbone_forward(
        x, params,
        frame_num=T, input_height=H, input_weight=W,
        output_height=OH, output_weight=OW, d_model=D, pad_unk=True)
    out = jax.block_until_ready(out)

    assert out.shape == (B, OH, OW, D), out.shape
    assert bool(jnp.all(jnp.isfinite(out)))
    print("KERNEL_OK")
</pallas_src>

<mosaic_0001>
module attributes {stable_mosaic.version = 11 : i64} {
  func.func @_encoder_layer_kernel(%arg0: i32, %arg1: i32, %arg2: memref<1x12x128xf32, #tpu.memory_space<vmem>>, %arg3: memref<1x8x12x16xbf16, #tpu.memory_space<vmem>>, %arg4: memref<1x8x16x12xbf16, #tpu.memory_space<vmem>>, %arg5: memref<1x8x12x16xbf16, #tpu.memory_space<vmem>>, %arg6: memref<128x128xbf16, #tpu.memory_space<vmem>>, %arg7: memref<1x128xf32, #tpu.memory_space<vmem>>, %arg8: memref<1x128xf32, #tpu.memory_space<vmem>>, %arg9: memref<1x128xf32, #tpu.memory_space<vmem>>, %arg10: memref<128x256xbf16, #tpu.memory_space<vmem>>, %arg11: memref<1x256xf32, #tpu.memory_space<vmem>>, %arg12: memref<256x128xbf16, #tpu.memory_space<vmem>>, %arg13: memref<1x128xf32, #tpu.memory_space<vmem>>, %arg14: memref<1x128xf32, #tpu.memory_space<vmem>>, %arg15: memref<1x128xf32, #tpu.memory_space<vmem>>, %arg16: memref<1x12x128xf32, #tpu.memory_space<vmem>>) attributes {dimension_semantics = [#tpu.dimension_semantics<parallel>, #tpu.dimension_semantics<parallel>], iteration_bounds = array<i64: 2, 1>, scalar_prefetch = 0 : i64, scratch_operands = 0 : i64, tpu.core_type = #tpu.core_type<tc>, window_params = [{transform_indices = @transform_0, window_bounds = array<i64: 1, 12, 128>}, {transform_indices = @transform_1, window_bounds = array<i64: 1, 8, 12, 16>}, {transform_indices = @transform_2, window_bounds = array<i64: 1, 8, 16, 12>}, {transform_indices = @transform_3, window_bounds = array<i64: 1, 8, 12, 16>}, {pipeline_mode = #tpu.pipeline_mode<synchronous>, transform_indices = @transform_4, window_bounds = array<i64: 128, 128>}, {pipeline_mode = #tpu.pipeline_mode<synchronous>, transform_indices = @transform_5, window_bounds = array<i64: 1, 128>}, {pipeline_mode = #tpu.pipeline_mode<synchronous>, transform_indices = @transform_6, window_bounds = array<i64: 1, 128>}, {pipeline_mode = #tpu.pipeline_mode<synchronous>, transform_indices = @transform_7, window_bounds = array<i64: 1, 128>}, {pipeline_mode = #tpu.pipeline_mode<synchronous>, transform_indices = @transform_8, window_bounds = array<i64: 128, 256>}, {pipeline_mode = #tpu.pipeline_mode<synchronous>, transform_indices = @transform_9, window_bounds = array<i64: 1, 256>}, {pipeline_mode = #tpu.pipeline_mode<synchronous>, transform_indices = @transform_10, window_bounds = array<i64: 256, 128>}, {pipeline_mode = #tpu.pipeline_mode<synchronous>, transform_indices = @transform_11, window_bounds = array<i64: 1, 128>}, {pipeline_mode = #tpu.pipeline_mode<synchronous>, transform_indices = @transform_12, window_bounds = array<i64: 1, 128>}, {pipeline_mode = #tpu.pipeline_mode<synchronous>, transform_indices = @transform_13, window_bounds = array<i64: 1, 128>}, {transform_indices = @transform_14, window_bounds = array<i64: 1, 12, 128>}]} {
    %c0 = arith.constant 0 : index
    %c0_0 = arith.constant 0 : index
    %c0_1 = arith.constant 0 : index
    %0 = vector.load %arg2[%c0, %c0_0, %c0_1] : memref<1x12x128xf32, #tpu.memory_space<vmem>>, vector<1x12x128xf32>
    %1 = vector.shape_cast %0 : vector<1x12x128xf32> to vector<12x128xf32>
    %c0_2 = arith.constant 0 : index
    %c0_3 = arith.constant 0 : index
    %c0_4 = arith.constant 0 : index
    %c0_5 = arith.constant 0 : index
    %2 = vector.load %arg3[%c0_2, %c0_3, %c0_4, %c0_5] : memref<1x8x12x16xbf16, #tpu.memory_space<vmem>>, vector<1x1x12x16xbf16>
    %3 = vector.shape_cast %2 : vector<1x1x12x16xbf16> to vector<12x16xbf16>
    %c0_6 = arith.constant 0 : index
    %c0_7 = arith.constant 0 : index
    %c0_8 = arith.constant 0 : index
    %c0_9 = arith.constant 0 : index
    %4 = vector.load %arg4[%c0_6, %c0_7, %c0_8, %c0_9] : memref<1x8x16x12xbf16, #tpu.memory_space<vmem>>, vector<1x1x16x12xbf16>
    %5 = vector.shape_cast %4 : vector<1x1x16x12xbf16> to vector<16x12xbf16>
    %c0_10 = arith.constant 0 : index
    %c0_11 = arith.constant 0 : index
    %c0_12 = arith.constant 0 : index
    %c0_13 = arith.constant 0 : index
    %6 = vector.load %arg5[%c0_10, %c0_11, %c0_12, %c0_13] : memref<1x8x12x16xbf16, #tpu.memory_space<vmem>>, vector<1x1x12x16xbf16>
    %7 = vector.shape_cast %6 : vector<1x1x12x16xbf16> to vector<12x16xbf16>
    %cst = arith.constant dense<0.000000e+00> : vector<12x12xf32>
    %8 = tpu.matmul %3, %5, %cst {dimension_numbers = #tpu.dot_dimension_numbers<[1], [0], [0], [1], [0, 0, 1, 1], [], []>} : vector<12x16xbf16>, vector<16x12xbf16>, vector<12x12xf32> -> vector<12x12xf32>
    %cst_14 = arith.constant dense<0xFF800000> : vector<12xf32>
    %9 = vector.multi_reduction <maximumf>, %8, %cst_14 [1] : vector<12x12xf32> to vector<12xf32>
    %10 = vector.shape_cast %9 : vector<12xf32> to vector<12x1xf32>
    %11 = vector.broadcast %10 : vector<12x1xf32> to vector<12x12xf32>
    %12 = arith.subf %8, %11 : vector<12x12xf32>
    %13 = math.exp %12 : vector<12x12xf32>
    %cst_15 = arith.constant dense<0.000000e+00> : vector<12xf32>
    %14 = vector.multi_reduction <add>, %13, %cst_15 [1] : vector<12x12xf32> to vector<12xf32>
    %15 = vector.shape_cast %14 : vector<12xf32> to vector<12x1xf32>
    %16 = tpu.reciprocal %15 {approx = true} : vector<12x1xf32> -> vector<12x1xf32>
    %17 = vector.broadcast %16 : vector<12x1xf32> to vector<12x12xf32>
    %18 = arith.mulf %13, %17 : vector<12x12xf32>
    %19 = arith.truncf %18 : vector<12x12xf32> to vector<12x12xbf16>
    %cst_16 = arith.constant dense<0.000000e+00> : vector<12x16xf32>
    %20 = tpu.matmul %19, %7, %cst_16 {dimension_numbers = #tpu.dot_dimension_numbers<[1], [0], [0], [1], [0, 0, 1, 1], [], []>} : vector<12x12xbf16>, vector<12x16xbf16>, vector<12x16xf32> -> vector<12x16xf32>
    %c0_17 = arith.constant 0 : index
    %c1 = arith.constant 1 : index
    %c0_18 = arith.constant 0 : index
    %c0_19 = arith.constant 0 : index
    %21 = vector.load %arg3[%c0_17, %c1, %c0_18, %c0_19] : memref<1x8x12x16xbf16, #tpu.memory_space<vmem>>, vector<1x1x12x16xbf16>
    %22 = vector.shape_cast %21 : vector<1x1x12x16xbf16> to vector<12x16xbf16>
    %c0_20 = arith.constant 0 : index
    %c1_21 = arith.constant 1 : index
    %c0_22 = arith.constant 0 : index
    %c0_23 = arith.constant 0 : index
    %23 = vector.load %arg4[%c0_20, %c1_21, %c0_22, %c0_23] : memref<1x8x16x12xbf16, #tpu.memory_space<vmem>>, vector<1x1x16x12xbf16>
    %24 = vector.shape_cast %23 : vector<1x1x16x12xbf16> to vector<16x12xbf16>
    %c0_24 = arith.constant 0 : index
    %c1_25 = arith.constant 1 : index
    %c0_26 = arith.constant 0 : index
    %c0_27 = arith.constant 0 : index
    %25 = vector.load %arg5[%c0_24, %c1_25, %c0_26, %c0_27] : memref<1x8x12x16xbf16, #tpu.memory_space<vmem>>, vector<1x1x12x16xbf16>
    %26 = vector.shape_cast %25 : vector<1x1x12x16xbf16> to vector<12x16xbf16>
    %cst_28 = arith.constant dense<0.000000e+00> : vector<12x12xf32>
    %27 = tpu.matmul %22, %24, %cst_28 {dimension_numbers = #tpu.dot_dimension_numbers<[1], [0], [0], [1], [0, 0, 1, 1], [], []>} : vector<12x16xbf16>, vector<16x12xbf16>, vector<12x12xf32> -> vector<12x12xf32>
    %cst_29 = arith.constant dense<0xFF800000> : vector<12xf32>
    %28 = vector.multi_reduction <maximumf>, %27, %cst_29 [1] : vector<12x12xf32> to vector<12xf32>
    %29 = vector.shape_cast %28 : vector<12xf32> to vector<12x1xf32>
    %30 = vector.broadcast %29 : vector<12x1xf32> to vector<12x12xf32>
    %31 = arith.subf %27, %30 : vector<12x12xf32>
    %32 = math.exp %31 : vector<12x12xf32>
    %cst_30 = arith.constant dense<0.000000e+00> : vector<12xf32>
    %33 = vector.multi_reduction <add>, %32, %cst_30 [1] : vector<12x12xf32> to vector<12xf32>
    %34 = vector.shape_cast %33 : vector<12xf32> to vector<12x1xf32>
    %35 = tpu.reciprocal %34 {approx = true} : vector<12x1xf32> -> vector<12x1xf32>
    %36 = vector.broadcast %35 : vector<12x1xf32> to vector<12x12xf32>
    %37 = arith.mulf %32, %36 : vector<12x12xf32>
    %38 = arith.truncf %37 : vector<12x12xf32> to vector<12x12xbf16>
    %cst_31 = arith.constant dense<0.000000e+00> : vector<12x16xf32>
    %39 = tpu.matmul %38, %26, %cst_31 {dimension_numbers = #tpu.dot_dimension_numbers<[1], [0], [0], [1], [0, 0, 1, 1], [], []>} : vector<12x12xbf16>, vector<12x16xbf16>, vector<12x16xf32> -> vector<12x16xf32>
    %c0_32 = arith.constant 0 : index
    %c2 = arith.constant 2 : index
    %c0_33 = arith.constant 0 : index
    %c0_34 = arith.constant 0 : index
    %40 = vector.load %arg3[%c0_32, %c2, %c0_33, %c0_34] : memref<1x8x12x16xbf16, #tpu.memory_space<vmem>>, vector<1x1x12x16xbf16>
    %41 = vector.shape_cast %40 : vector<1x1x12x16xbf16> to vector<12x16xbf16>
    %c0_35 = arith.constant 0 : index
    %c2_36 = arith.constant 2 : index
    %c0_37 = arith.constant 0 : index
    %c0_38 = arith.constant 0 : index
    %42 = vector.load %arg4[%c0_35, %c2_36, %c0_37, %c0_38] : memref<1x8x16x12xbf16, #tpu.memory_space<vmem>>, vector<1x1x16x12xbf16>
    %43 = vector.shape_cast %42 : vector<1x1x16x12xbf16> to vector<16x12xbf16>
    %c0_39 = arith.constant 0 : index
    %c2_40 = arith.constant 2 : index
    %c0_41 = arith.constant 0 : index
    %c0_42 = arith.constant 0 : index
    %44 = vector.load %arg5[%c0_39, %c2_40, %c0_41, %c0_42] : memref<1x8x12x16xbf16, #tpu.memory_space<vmem>>, vector<1x1x12x16xbf16>
    %45 = vector.shape_cast %44 : vector<1x1x12x16xbf16> to vector<12x16xbf16>
    %cst_43 = arith.constant dense<0.000000e+00> : vector<12x12xf32>
    %46 = tpu.matmul %41, %43, %cst_43 {dimension_numbers = #tpu.dot_dimension_numbers<[1], [0], [0], [1], [0, 0, 1, 1], [], []>} : vector<12x16xbf16>, vector<16x12xbf16>, vector<12x12xf32> -> vector<12x12xf32>
    %cst_44 = arith.constant dense<0xFF800000> : vector<12xf32>
    %47 = vector.multi_reduction <maximumf>, %46, %cst_44 [1] : vector<12x12xf32> to vector<12xf32>
    %48 = vector.shape_cast %47 : vector<12xf32> to vector<12x1xf32>
    %49 = vector.broadcast %48 : vector<12x1xf32> to vector<12x12xf32>
    %50 = arith.subf %46, %49 : vector<12x12xf32>
    %51 = math.exp %50 : vector<12x12xf32>
    %cst_45 = arith.constant dense<0.000000e+00> : vector<12xf32>
    %52 = vector.multi_reduction <add>, %51, %cst_45 [1] : vector<12x12xf32> to vector<12xf32>
    %53 = vector.shape_cast %52 : vector<12xf32> to vector<12x1xf32>
    %54 = tpu.reciprocal %53 {approx = true} : vector<12x1xf32> -> vector<12x1xf32>
    %55 = vector.broadcast %54 : vector<12x1xf32> to vector<12x12xf32>
    %56 = arith.mulf %51, %55 : vector<12x12xf32>
    %57 = arith.truncf %56 : vector<12x12xf32> to vector<12x12xbf16>
    %cst_46 = arith.constant dense<0.000000e+00> : vector<12x16xf32>
    %58 = tpu.matmul %57, %45, %cst_46 {dimension_numbers = #tpu.dot_dimension_numbers<[1], [0], [0], [1], [0, 0, 1, 1], [], []>} : vector<12x12xbf16>, vector<12x16xbf16>, vector<12x16xf32> -> vector<12x16xf32>
    %c0_47 = arith.constant 0 : index
    %c3 = arith.constant 3 : index
    %c0_48 = arith.constant 0 : index
    %c0_49 = arith.constant 0 : index
    %59 = vector.load %arg3[%c0_47, %c3, %c0_48, %c0_49] : memref<1x8x12x16xbf16, #tpu.memory_space<vmem>>, vector<1x1x12x16xbf16>
    %60 = vector.shape_cast %59 : vector<1x1x12x16xbf16> to vector<12x16xbf16>
    %c0_50 = arith.constant 0 : index
    %c3_51 = arith.constant 3 : index
    %c0_52 = arith.constant 0 : index
    %c0_53 = arith.constant 0 : index
    %61 = vector.load %arg4[%c0_50, %c3_51, %c0_52, %c0_53] : memref<1x8x16x12xbf16, #tpu.memory_space<vmem>>, vector<1x1x16x12xbf16>
    %62 = vector.shape_cast %61 : vector<1x1x16x12xbf16> to vector<16x12xbf16>
    %c0_54 = arith.constant 0 : index
    %c3_55 = arith.constant 3 : index
    %c0_56 = arith.constant 0 : index
    %c0_57 = arith.constant 0 : index
    %63 = vector.load %arg5[%c0_54, %c3_55, %c0_56, %c0_57] : memref<1x8x12x16xbf16, #tpu.memory_space<vmem>>, vector<1x1x12x16xbf16>
    %64 = vector.shape_cast %63 : vector<1x1x12x16xbf16> to vector<12x16xbf16>
    %cst_58 = arith.constant dense<0.000000e+00> : vector<12x12xf32>
    %65 = tpu.matmul %60, %62, %cst_58 {dimension_numbers = #tpu.dot_dimension_numbers<[1], [0], [0], [1], [0, 0, 1, 1], [], []>} : vector<12x16xbf16>, vector<16x12xbf16>, vector<12x12xf32> -> vector<12x12xf32>
    %cst_59 = arith.constant dense<0xFF800000> : vector<12xf32>
    %66 = vector.multi_reduction <maximumf>, %65, %cst_59 [1] : vector<12x12xf32> to vector<12xf32>
    %67 = vector.shape_cast %66 : vector<12xf32> to vector<12x1xf32>
    %68 = vector.broadcast %67 : vector<12x1xf32> to vector<12x12xf32>
    %69 = arith.subf %65, %68 : vector<12x12xf32>
    %70 = math.exp %69 : vector<12x12xf32>
    %cst_60 = arith.constant dense<0.000000e+00> : vector<12xf32>
    %71 = vector.multi_reduction <add>, %70, %cst_60 [1] : vector<12x12xf32> to vector<12xf32>
    %72 = vector.shape_cast %71 : vector<12xf32> to vector<12x1xf32>
    %73 = tpu.reciprocal %72 {approx = true} : vector<12x1xf32> -> vector<12x1xf32>
    %74 = vector.broadcast %73 : vector<12x1xf32> to vector<12x12xf32>
    %75 = arith.mulf %70, %74 : vector<12x12xf32>
    %76 = arith.truncf %75 : vector<12x12xf32> to vector<12x12xbf16>
    %cst_61 = arith.constant dense<0.000000e+00> : vector<12x16xf32>
    %77 = tpu.matmul %76, %64, %cst_61 {dimension_numbers = #tpu.dot_dimension_numbers<[1], [0], [0], [1], [0, 0, 1, 1], [], []>} : vector<12x12xbf16>, vector<12x16xbf16>, vector<12x16xf32> -> vector<12x16xf32>
    %c0_62 = arith.constant 0 : index
    %c4 = arith.constant 4 : index
    %c0_63 = arith.constant 0 : index
    %c0_64 = arith.constant 0 : index
    %78 = vector.load %arg3[%c0_62, %c4, %c0_63, %c0_64] : memref<1x8x12x16xbf16, #tpu.memory_space<vmem>>, vector<1x1x12x16xbf16>
    %79 = vector.shape_cast %78 : vector<1x1x12x16xbf16> to vector<12x16xbf16>
    %c0_65 = arith.constant 0 : index
    %c4_66 = arith.constant 4 : index
    %c0_67 = arith.constant 0 : index
    %c0_68 = arith.constant 0 : index
    %80 = vector.load %arg4[%c0_65, %c4_66, %c0_67, %c0_68] : memref<1x8x16x12xbf16, #tpu.memory_space<vmem>>, vector<1x1x16x12xbf16>
    %81 = vector.shape_cast %80 : vector<1x1x16x12xbf16> to vector<16x12xbf16>
    %c0_69 = arith.constant 0 : index
    %c4_70 = arith.constant 4 : index
    %c0_71 = arith.constant 0 : index
    %c0_72 = arith.constant 0 : index
    %82 = vector.load %arg5[%c0_69, %c4_70, %c0_71, %c0_72] : memref<1x8x12x16xbf16, #tpu.memory_space<vmem>>, vector<1x1x12x16xbf16>
    %83 = vector.shape_cast %82 : vector<1x1x12x16xbf16> to vector<12x16xbf16>
    %cst_73 = arith.constant dense<0.000000e+00> : vector<12x12xf32>
    %84 = tpu.matmul %79, %81, %cst_73 {dimension_numbers = #tpu.dot_dimension_numbers<[1], [0], [0], [1], [0, 0, 1, 1], [], []>} : vector<12x16xbf16>, vector<16x12xbf16>, vector<12x12xf32> -> vector<12x12xf32>
    %cst_74 = arith.constant dense<0xFF800000> : vector<12xf32>
    %85 = vector.multi_reduction <maximumf>, %84, %cst_74 [1] : vector<12x12xf32> to vector<12xf32>
    %86 = vector.shape_cast %85 : vector<12xf32> to vector<12x1xf32>
    %87 = vector.broadcast %86 : vector<12x1xf32> to vector<12x12xf32>
    %88 = arith.subf %84, %87 : vector<12x12xf32>
    %89 = math.exp %88 : vector<12x12xf32>
    %cst_75 = arith.constant dense<0.000000e+00> : vector<12xf32>
    %90 = vector.multi_reduction <add>, %89, %cst_75 [1] : vector<12x12xf32> to vector<12xf32>
    %91 = vector.shape_cast %90 : vector<12xf32> to vector<12x1xf32>
    %92 = tpu.reciprocal %91 {approx = true} : vector<12x1xf32> -> vector<12x1xf32>
    %93 = vector.broadcast %92 : vector<12x1xf32> to vector<12x12xf32>
    %94 = arith.mulf %89, %93 : vector<12x12xf32>
    %95 = arith.truncf %94 : vector<12x12xf32> to vector<12x12xbf16>
    %cst_76 = arith.constant dense<0.000000e+00> : vector<12x16xf32>
    %96 = tpu.matmul %95, %83, %cst_76 {dimension_numbers = #tpu.dot_dimension_numbers<[1], [0], [0], [1], [0, 0, 1, 1], [], []>} : vector<12x12xbf16>, vector<12x16xbf16>, vector<12x16xf32> -> vector<12x16xf32>
    %c0_77 = arith.constant 0 : index
    %c5 = arith.constant 5 : index
    %c0_78 = arith.constant 0 : index
    %c0_79 = arith.constant 0 : index
    %97 = vector.load %arg3[%c0_77, %c5, %c0_78, %c0_79] : memref<1x8x12x16xbf16, #tpu.memory_space<vmem>>, vector<1x1x12x16xbf16>
    %98 = vector.shape_cast %97 : vector<1x1x12x16xbf16> to vector<12x16xbf16>
    %c0_80 = arith.constant 0 : index
    %c5_81 = arith.constant 5 : index
    %c0_82 = arith.constant 0 : index
    %c0_83 = arith.constant 0 : index
    %99 = vector.load %arg4[%c0_80, %c5_81, %c0_82, %c0_83] : memref<1x8x16x12xbf16, #tpu.memory_space<vmem>>, vector<1x1x16x12xbf16>
    %100 = vector.shape_cast %99 : vector<1x1x16x12xbf16> to vector<16x12xbf16>
    %c0_84 = arith.constant 0 : index
    %c5_85 = arith.constant 5 : index
    %c0_86 = arith.constant 0 : index
    %c0_87 = arith.constant 0 : index
    %101 = vector.load %arg5[%c0_84, %c5_85, %c0_86, %c0_87] : memref<1x8x12x16xbf16, #tpu.memory_space<vmem>>, vector<1x1x12x16xbf16>
    %102 = vector.shape_cast %101 : vector<1x1x12x16xbf16> to vector<12x16xbf16>
    %cst_88 = arith.constant dense<0.000000e+00> : vector<12x12xf32>
    %103 = tpu.matmul %98, %100, %cst_88 {dimension_numbers = #tpu.dot_dimension_numbers<[1], [0], [0], [1], [0, 0, 1, 1], [], []>} : vector<12x16xbf16>, vector<16x12xbf16>, vector<12x12xf32> -> vector<12x12xf32>
    %cst_89 = arith.constant dense<0xFF800000> : vector<12xf32>
    %104 = vector.multi_reduction <maximumf>, %103, %cst_89 [1] : vector<12x12xf32> to vector<12xf32>
    %105 = vector.shape_cast %104 : vector<12xf32> to vector<12x1xf32>
    %106 = vector.broadcast %105 : vector<12x1xf32> to vector<12x12xf32>
    %107 = arith.subf %103, %106 : vector<12x12xf32>
    %108 = math.exp %107 : vector<12x12xf32>
    %cst_90 = arith.constant dense<0.000000e+00> : vector<12xf32>
    %109 = vector.multi_reduction <add>, %108, %cst_90 [1] : vector<12x12xf32> to vector<12xf32>
    %110 = vector.shape_cast %109 : vector<12xf32> to vector<12x1xf32>
    %111 = tpu.reciprocal %110 {approx = true} : vector<12x1xf32> -> vector<12x1xf32>
    %112 = vector.broadcast %111 : vector<12x1xf32> to vector<12x12xf32>
    %113 = arith.mulf %108, %112 : vector<12x12xf32>
    %114 = arith.truncf %113 : vector<12x12xf32> to vector<12x12xbf16>
    %cst_91 = arith.constant dense<0.000000e+00> : vector<12x16xf32>
    %115 = tpu.matmul %114, %102, %cst_91 {dimension_numbers = #tpu.dot_dimension_numbers<[1], [0], [0], [1], [0, 0, 1, 1], [], []>} : vector<12x12xbf16>, vector<12x16xbf16>, vector<12x16xf32> -> vector<12x16xf32>
    %c0_92 = arith.constant 0 : index
    %c6 = arith.constant 6 : index
    %c0_93 = arith.constant 0 : index
    %c0_94 = arith.constant 0 : index
    %116 = vector.load %arg3[%c0_92, %c6, %c0_93, %c0_94] : memref<1x8x12x16xbf16, #tpu.memory_space<vmem>>, vector<1x1x12x16xbf16>
    %117 = vector.shape_cast %116 : vector<1x1x12x16xbf16> to vector<12x16xbf16>
    %c0_95 = arith.constant 0 : index
    %c6_96 = arith.constant 6 : index
    %c0_97 = arith.constant 0 : index
    %c0_98 = arith.constant 0 : index
    %118 = vector.load %arg4[%c0_95, %c6_96, %c0_97, %c0_98] : memref<1x8x16x12xbf16, #tpu.memory_space<vmem>>, vector<1x1x16x12xbf16>
    %119 = vector.shape_cast %118 : vector<1x1x16x12xbf16> to vector<16x12xbf16>
    %c0_99 = arith.constant 0 : index
    %c6_100 = arith.constant 6 : index
    %c0_101 = arith.constant 0 : index
    %c0_102 = arith.constant 0 : index
    %120 = vector.load %arg5[%c0_99, %c6_100, %c0_101, %c0_102] : memref<1x8x12x16xbf16, #tpu.memory_space<vmem>>, vector<1x1x12x16xbf16>
    %121 = vector.shape_cast %120 : vector<1x1x12x16xbf16> to vector<12x16xbf16>
    %cst_103 = arith.constant dense<0.000000e+00> : vector<12x12xf32>
    %122 = tpu.matmul %117, %119, %cst_103 {dimension_numbers = #tpu.dot_dimension_numbers<[1], [0], [0], [1], [0, 0, 1, 1], [], []>} : vector<12x16xbf16>, vector<16x12xbf16>, vector<12x12xf32> -> vector<12x12xf32>
    %cst_104 = arith.constant dense<0xFF800000> : vector<12xf32>
    %123 = vector.multi_reduction <maximumf>, %122, %cst_104 [1] : vector<12x12xf32> to vector<12xf32>
    %124 = vector.shape_cast %123 : vector<12xf32> to vector<12x1xf32>
    %125 = vector.broadcast %124 : vector<12x1xf32> to vector<12x12xf32>
    %126 = arith.subf %122, %125 : vector<12x12xf32>
    %127 = math.exp %126 : vector<12x12xf32>
    %cst_105 = arith.constant dense<0.000000e+00> : vector<12xf32>
    %128 = vector.multi_reduction <add>, %127, %cst_105 [1] : vector<12x12xf32> to vector<12xf32>
    %129 = vector.shape_cast %128 : vector<12xf32> to vector<12x1xf32>
    %130 = tpu.reciprocal %129 {approx = true} : vector<12x1xf32> -> vector<12x1xf32>
    %131 = vector.broadcast %130 : vector<12x1xf32> to vector<12x12xf32>
    %132 = arith.mulf %127, %131 : vector<12x12xf32>
    %133 = arith.truncf %132 : vector<12x12xf32> to vector<12x12xbf16>
    %cst_106 = arith.constant dense<0.000000e+00> : vector<12x16xf32>
    %134 = tpu.matmul %133, %121, %cst_106 {dimension_numbers = #tpu.dot_dimension_numbers<[1], [0], [0], [1], [0, 0, 1, 1], [], []>} : vector<12x12xbf16>, vector<12x16xbf16>, vector<12x16xf32> -> vector<12x16xf32>
    %c0_107 = arith.constant 0 : index
    %c7 = arith.constant 7 : index
    %c0_108 = arith.constant 0 : index
    %c0_109 = arith.constant 0 : index
    %135 = vector.load %arg3[%c0_107, %c7, %c0_108, %c0_109] : memref<1x8x12x16xbf16, #tpu.memory_space<vmem>>, vector<1x1x12x16xbf16>
    %136 = vector.shape_cast %135 : vector<1x1x12x16xbf16> to vector<12x16xbf16>
    %c0_110 = arith.constant 0 : index
    %c7_111 = arith.constant 7 : index
    %c0_112 = arith.constant 0 : index
    %c0_113 = arith.constant 0 : index
    %137 = vector.load %arg4[%c0_110, %c7_111, %c0_112, %c0_113] : memref<1x8x16x12xbf16, #tpu.memory_space<vmem>>, vector<1x1x16x12xbf16>
    %138 = vector.shape_cast %137 : vector<1x1x16x12xbf16> to vector<16x12xbf16>
    %c0_114 = arith.constant 0 : index
    %c7_115 = arith.constant 7 : index
    %c0_116 = arith.constant 0 : index
    %c0_117 = arith.constant 0 : index
    %139 = vector.load %arg5[%c0_114, %c7_115, %c0_116, %c0_117] : memref<1x8x12x16xbf16, #tpu.memory_space<vmem>>, vector<1x1x12x16xbf16>
    %140 = vector.shape_cast %139 : vector<1x1x12x16xbf16> to vector<12x16xbf16>
    %cst_118 = arith.constant dense<0.000000e+00> : vector<12x12xf32>
    %141 = tpu.matmul %136, %138, %cst_118 {dimension_numbers = #tpu.dot_dimension_numbers<[1], [0], [0], [1], [0, 0, 1, 1], [], []>} : vector<12x16xbf16>, vector<16x12xbf16>, vector<12x12xf32> -> vector<12x12xf32>
    %cst_119 = arith.constant dense<0xFF800000> : vector<12xf32>
    %142 = vector.multi_reduction <maximumf>, %141, %cst_119 [1] : vector<12x12xf32> to vector<12xf32>
    %143 = vector.shape_cast %142 : vector<12xf32> to vector<12x1xf32>
    %144 = vector.broadcast %143 : vector<12x1xf32> to vector<12x12xf32>
    %145 = arith.subf %141, %144 : vector<12x12xf32>
    %146 = math.exp %145 : vector<12x12xf32>
    %cst_120 = arith.constant dense<0.000000e+00> : vector<12xf32>
    %147 = vector.multi_reduction <add>, %146, %cst_120 [1] : vector<12x12xf32> to vector<12xf32>
    %148 = vector.shape_cast %147 : vector<12xf32> to vector<12x1xf32>
    %149 = tpu.reciprocal %148 {approx = true} : vector<12x1xf32> -> vector<12x1xf32>
    %150 = vector.broadcast %149 : vector<12x1xf32> to vector<12x12xf32>
    %151 = arith.mulf %146, %150 : vector<12x12xf32>
    %152 = arith.truncf %151 : vector<12x12xf32> to vector<12x12xbf16>
    %cst_121 = arith.constant dense<0.000000e+00> : vector<12x16xf32>
    %153 = tpu.matmul %152, %140, %cst_121 {dimension_numbers = #tpu.dot_dimension_numbers<[1], [0], [0], [1], [0, 0, 1, 1], [], []>} : vector<12x12xbf16>, vector<12x16xbf16>, vector<12x16xf32> -> vector<12x16xf32>
    %154 = tpu.concatenate %20, %39, %58, %77, %96, %115, %134, %153 in 1 : vector<12x16xf32>, vector<12x16xf32>, vector<12x16xf32>, vector<12x16xf32>, vector<12x16xf32>, vector<12x16xf32>, vector<12x16xf32>, vector<12x16xf32> -> vector<12x128xf32>
    %155 = arith.truncf %154 : vector<12x128xf32> to vector<12x128xbf16>
    %c0_122 = arith.constant 0 : index
    %c0_123 = arith.constant 0 : index
    %156 = vector.load %arg6[%c0_122, %c0_123] : memref<128x128xbf16, #tpu.memory_space<vmem>>, vector<128x128xbf16>
    %cst_124 = arith.constant dense<0.000000e+00> : vector<12x128xf32>
    %157 = tpu.matmul %155, %156, %cst_124 {dimension_numbers = #tpu.dot_dimension_numbers<[1], [0], [0], [1], [0, 0, 1, 1], [], []>} : vector<12x128xbf16>, vector<128x128xbf16>, vector<12x128xf32> -> vector<12x128xf32>
    %c0_125 = arith.constant 0 : index
    %c0_126 = arith.constant 0 : index
    %158 = vector.load %arg7[%c0_125, %c0_126] : memref<1x128xf32, #tpu.memory_space<vmem>>, vector<1x128xf32>
    %159 = vector.broadcast %158 : vector<1x128xf32> to vector<12x128xf32>
    %160 = arith.addf %157, %159 : vector<12x128xf32>
    %161 = arith.addf %1, %160 : vector<12x128xf32>
    %c0_127 = arith.constant 0 : index
    %c0_128 = arith.constant 0 : index
    %162 = vector.load %arg8[%c0_127, %c0_128] : memref<1x128xf32, #tpu.memory_space<vmem>>, vector<1x128xf32>
    %c0_129 = arith.constant 0 : index
    %c0_130 = arith.constant 0 : index
    %163 = vector.load %arg9[%c0_129, %c0_130] : memref<1x128xf32, #tpu.memory_space<vmem>>, vector<1x128xf32>
    %cst_131 = arith.constant dense<0.000000e+00> : vector<12xf32>
    %164 = vector.multi_reduction <add>, %161, %cst_131 [1] : vector<12x128xf32> to vector<12xf32>
    %165 = vector.shape_cast %164 : vector<12xf32> to vector<12x1xf32>
    %cst_132 = arith.constant 1.280000e+02 : f32
    %166 = vector.broadcast %cst_132 : f32 to vector<12x1xf32>
    %167 = arith.divf %165, %166 : vector<12x1xf32>
    %168 = vector.broadcast %167 : vector<12x1xf32> to vector<12x128xf32>
    %169 = arith.subf %161, %168 : vector<12x128xf32>
    %170 = arith.mulf %169, %169 : vector<12x128xf32>
    %cst_133 = arith.constant dense<0.000000e+00> : vector<12xf32>
    %171 = vector.multi_reduction <add>, %170, %cst_133 [1] : vector<12x128xf32> to vector<12xf32>
    %172 = vector.shape_cast %171 : vector<12xf32> to vector<12x1xf32>
    %cst_134 = arith.constant 1.280000e+02 : f32
    %173 = vector.broadcast %cst_134 : f32 to vector<12x1xf32>
    %174 = arith.divf %172, %173 : vector<12x1xf32>
    %175 = vector.broadcast %167 : vector<12x1xf32> to vector<12x128xf32>
    %176 = arith.subf %161, %175 : vector<12x128xf32>
    %cst_135 = arith.constant 9.99999974E-6 : f32
    %177 = vector.broadcast %cst_135 : f32 to vector<12x1xf32>
    %178 = arith.addf %174, %177 : vector<12x1xf32>
    %179 = math.rsqrt %178 : vector<12x1xf32>
    %180 = vector.broadcast %179 : vector<12x1xf32> to vector<12x128xf32>
    %181 = arith.mulf %176, %180 : vector<12x128xf32>
    %182 = vector.broadcast %162 : vector<1x128xf32> to vector<12x128xf32>
    %183 = arith.mulf %181, %182 : vector<12x128xf32>
    %184 = vector.broadcast %163 : vector<1x128xf32> to vector<12x128xf32>
    %185 = arith.addf %183, %184 : vector<12x128xf32>
    %186 = arith.truncf %185 : vector<12x128xf32> to vector<12x128xbf16>
    %c0_136 = arith.constant 0 : index
    %c0_137 = arith.constant 0 : index
    %187 = vector.load %arg10[%c0_136, %c0_137] : memref<128x256xbf16, #tpu.memory_space<vmem>>, vector<128x256xbf16>
    %cst_138 = arith.constant dense<0.000000e+00> : vector<12x256xf32>
    %188 = tpu.matmul %186, %187, %cst_138 {dimension_numbers = #tpu.dot_dimension_numbers<[1], [0], [0], [1], [0, 0, 1, 1], [], []>} : vector<12x128xbf16>, vector<128x256xbf16>, vector<12x256xf32> -> vector<12x256xf32>
    %c0_139 = arith.constant 0 : index
    %c0_140 = arith.constant 0 : index
    %189 = vector.load %arg11[%c0_139, %c0_140] : memref<1x256xf32, #tpu.memory_space<vmem>>, vector<1x256xf32>
    %190 = vector.broadcast %189 : vector<1x256xf32> to vector<12x256xf32>
    %191 = arith.addf %188, %190 : vector<12x256xf32>
    %cst_141 = arith.constant 0.000000e+00 : f32
    %192 = vector.broadcast %cst_141 : f32 to vector<12x256xf32>
    %193 = arith.cmpf oge, %191, %192 : vector<12x256xf32>
    %cst_142 = arith.constant 0.00999999977 : f32
    %194 = vector.broadcast %cst_142 : f32 to vector<12x256xf32>
    %195 = arith.mulf %194, %191 : vector<12x256xf32>
    %196 = arith.select %193, %191, %195 : vector<12x256xi1>, vector<12x256xf32>
    %197 = arith.truncf %196 : vector<12x256xf32> to vector<12x256xbf16>
    %c0_143 = arith.constant 0 : index
    %c0_144 = arith.constant 0 : index
    %198 = vector.load %arg12[%c0_143, %c0_144] : memref<256x128xbf16, #tpu.memory_space<vmem>>, vector<256x128xbf16>
    %cst_145 = arith.constant dense<0.000000e+00> : vector<12x128xf32>
    %199 = tpu.matmul %197, %198, %cst_145 {dimension_numbers = #tpu.dot_dimension_numbers<[1], [0], [0], [1], [0, 0, 1, 1], [], []>} : vector<12x256xbf16>, vector<256x128xbf16>, vector<12x128xf32> -> vector<12x128xf32>
    %c0_146 = arith.constant 0 : index
    %c0_147 = arith.constant 0 : index
    %200 = vector.load %arg13[%c0_146, %c0_147] : memref<1x128xf32, #tpu.memory_space<vmem>>, vector<1x128xf32>
    %201 = vector.broadcast %200 : vector<1x128xf32> to vector<12x128xf32>
    %202 = arith.addf %199, %201 : vector<12x128xf32>
    %203 = arith.addf %185, %202 : vector<12x128xf32>
    %c0_148 = arith.constant 0 : index
    %c0_149 = arith.constant 0 : index
    %204 = vector.load %arg14[%c0_148, %c0_149] : memref<1x128xf32, #tpu.memory_space<vmem>>, vector<1x128xf32>
    %c0_150 = arith.constant 0 : index
    %c0_151 = arith.constant 0 : index
    %205 = vector.load %arg15[%c0_150, %c0_151] : memref<1x128xf32, #tpu.memory_space<vmem>>, vector<1x128xf32>
    %cst_152 = arith.constant dense<0.000000e+00> : vector<12xf32>
    %206 = vector.multi_reduction <add>, %203, %cst_152 [1] : vector<12x128xf32> to vector<12xf32>
    %207 = vector.shape_cast %206 : vector<12xf32> to vector<12x1xf32>
    %cst_153 = arith.constant 1.280000e+02 : f32
    %208 = vector.broadcast %cst_153 : f32 to vector<12x1xf32>
    %209 = arith.divf %207, %208 : vector<12x1xf32>
    %210 = vector.broadcast %209 : vector<12x1xf32> to vector<12x128xf32>
    %211 = arith.subf %203, %210 : vector<12x128xf32>
    %212 = arith.mulf %211, %211 : vector<12x128xf32>
    %cst_154 = arith.constant dense<0.000000e+00> : vector<12xf32>
    %213 = vector.multi_reduction <add>, %212, %cst_154 [1] : vector<12x128xf32> to vector<12xf32>
    %214 = vector.shape_cast %213 : vector<12xf32> to vector<12x1xf32>
    %cst_155 = arith.constant 1.280000e+02 : f32
    %215 = vector.broadcast %cst_155 : f32 to vector<12x1xf32>
    %216 = arith.divf %214, %215 : vector<12x1xf32>
    %217 = vector.broadcast %209 : vector<12x1xf32> to vector<12x128xf32>
    %218 = arith.subf %203, %217 : vector<12x128xf32>
    %cst_156 = arith.constant 9.99999974E-6 : f32
    %219 = vector.broadcast %cst_156 : f32 to vector<12x1xf32>
    %220 = arith.addf %216, %219 : vector<12x1xf32>
    %221 = math.rsqrt %220 : vector<12x1xf32>
    %222 = vector.broadcast %221 : vector<12x1xf32> to vector<12x128xf32>
    %223 = arith.mulf %218, %222 : vector<12x128xf32>
    %224 = vector.broadcast %204 : vector<1x128xf32> to vector<12x128xf32>
    %225 = arith.mulf %223, %224 : vector<12x128xf32>
    %226 = vector.broadcast %205 : vector<1x128xf32> to vector<12x128xf32>
    %227 = arith.addf %225, %226 : vector<12x128xf32>
    %c0_157 = arith.constant 0 : index
    %c0_158 = arith.constant 0 : index
    %c0_159 = arith.constant 0 : index
    %228 = vector.load %arg16[%c0_157, %c0_158, %c0_159] : memref<1x12x128xf32, #tpu.memory_space<vmem>>, vector<1x12x128xf32>
    %229 = vector.shape_cast %228 : vector<1x12x128xf32> to vector<12x128xf32>
    %230 = vector.shape_cast %227 : vector<12x128xf32> to vector<1x12x128xf32>
    tpu.vector_store %arg16[%c0_157, %c0_158, %c0_159], %230 {strides = array<i32>} : memref<1x12x128xf32, #tpu.memory_space<vmem>>, vector<1x12x128xf32>,
    return
  }
  func.func @transform_0(%arg0: i32, %arg1: i32) -> (i32, i32, i32) {
    %c0_i32 = arith.constant 0 : i32
    %c0_i32_0 = arith.constant 0 : i32
    return %arg0, %arg1, %c0_i32 : i32, i32, i32
  }
  func.func @transform_1(%arg0: i32, %arg1: i32) -> (i32, i32, i32, i32) {
    %c0_i32 = arith.constant 0 : i32
    %c0_i32_0 = arith.constant 0 : i32
    %c0_i32_1 = arith.constant 0 : i32
    return %arg0, %c0_i32, %arg1, %c0_i32_0 : i32, i32, i32, i32
  }
  func.func @transform_2(%arg0: i32, %arg1: i32) -> (i32, i32, i32, i32) {
    %c0_i32 = arith.constant 0 : i32
    %c0_i32_0 = arith.constant 0 : i32
    %c0_i32_1 = arith.constant 0 : i32
    %c0_i32_2 = arith.constant 0 : i32
    return %arg0, %c0_i32, %c0_i32_0, %c0_i32_1 : i32, i32, i32, i32
  }
  func.func @transform_3(%arg0: i32, %arg1: i32) -> (i32, i32, i32, i32) {
    %c0_i32 = arith.constant 0 : i32
    %c0_i32_0 = arith.constant 0 : i32
    %c0_i32_1 = arith.constant 0 : i32
    %c0_i32_2 = arith.constant 0 : i32
    return %arg0, %c0_i32, %c0_i32_0, %c0_i32_1 : i32, i32, i32, i32
  }
  func.func @transform_4(%arg0: i32, %arg1: i32) -> (i32, i32) {
    %c0_i32 = arith.constant 0 : i32
    %c0_i32_0 = arith.constant 0 : i32
    %c0_i32_1 = arith.constant 0 : i32
    return %c0_i32, %c0_i32_0 : i32, i32
  }
  func.func @transform_5(%arg0: i32, %arg1: i32) -> (i32, i32) {
    %c0_i32 = arith.constant 0 : i32
    %c0_i32_0 = arith.constant 0 : i32
    %c0_i32_1 = arith.constant 0 : i32
    return %c0_i32, %c0_i32_0 : i32, i32
  }
  func.func @transform_6(%arg0: i32, %arg1: i32) -> (i32, i32) {
    %c0_i32 = arith.constant 0 : i32
    %c0_i32_0 = arith.constant 0 : i32
    %c0_i32_1 = arith.constant 0 : i32
    return %c0_i32, %c0_i32_0 : i32, i32
  }
  func.func @transform_7(%arg0: i32, %arg1: i32) -> (i32, i32) {
    %c0_i32 = arith.constant 0 : i32
    %c0_i32_0 = arith.constant 0 : i32
    %c0_i32_1 = arith.constant 0 : i32
    return %c0_i32, %c0_i32_0 : i32, i32
  }
  func.func @transform_8(%arg0: i32, %arg1: i32) -> (i32, i32) {
    %c0_i32 = arith.constant 0 : i32
    %c0_i32_0 = arith.constant 0 : i32
    %c0_i32_1 = arith.constant 0 : i32
    return %c0_i32, %c0_i32_0 : i32, i32
  }
  func.func @transform_9(%arg0: i32, %arg1: i32) -> (i32, i32) {
    %c0_i32 = arith.constant 0 : i32
    %c0_i32_0 = arith.constant 0 : i32
    %c0_i32_1 = arith.constant 0 : i32
    return %c0_i32, %c0_i32_0 : i32, i32
  }
  func.func @transform_10(%arg0: i32, %arg1: i32) -> (i32, i32) {
    %c0_i32 = arith.constant 0 : i32
    %c0_i32_0 = arith.constant 0 : i32
    %c0_i32_1 = arith.constant 0 : i32
    return %c0_i32, %c0_i32_0 : i32, i32
  }
  func.func @transform_11(%arg0: i32, %arg1: i32) -> (i32, i32) {
    %c0_i32 = arith.constant 0 : i32
    %c0_i32_0 = arith.constant 0 : i32
    %c0_i32_1 = arith.constant 0 : i32
    return %c0_i32, %c0_i32_0 : i32, i32
  }
  func.func @transform_12(%arg0: i32, %arg1: i32) -> (i32, i32) {
    %c0_i32 = arith.constant 0 : i32
    %c0_i32_0 = arith.constant 0 : i32
    %c0_i32_1 = arith.constant 0 : i32
    return %c0_i32, %c0_i32_0 : i32, i32
  }
  func.func @transform_13(%arg0: i32, %arg1: i32) -> (i32, i32) {
    %c0_i32 = arith.constant 0 : i32
    %c0_i32_0 = arith.constant 0 : i32
    %c0_i32_1 = arith.constant 0 : i32
    return %c0_i32, %c0_i32_0 : i32, i32
  }
  func.func @transform_14(%arg0: i32, %arg1: i32) -> (i32, i32, i32) {
    %c0_i32 = arith.constant 0 : i32
    %c0_i32_0 = arith.constant 0 : i32
    return %arg0, %arg1, %c0_i32 : i32, i32, i32
  }
}

</mosaic_0001>

<bundles_post_ra>
// kernel: tpu_custom_call.1
= control target key start
LH: loop header
LB: loop body
LE: loop exit
PB: predicated region body
PF: predicated region fallthrough
CT: control target
= control target key end

     0   :  { %s2636_s29 = smov 0   ;;  %s2638_s30 = smov 0   ;;  %s3120_s0 = inlined_call_operand.vmem [shape: f32[2,12,128], index: 0, kind: input, shape index: {}]   ;;  %s3121_s1 = inlined_call_operand.vmem [shape: bf16[2,8,12,16], index: 1, kind: input, shape index: {}]   ;;  %s3122_s2 = inlined_call_operand.vmem [shape: bf16[2,8,16,12], index: 2, kind: input, shape index: {}]   ;;  %s3123_s3 = inlined_call_operand.vmem [shape: bf16[2,8,12,16], index: 3, kind: input, shape index: {}]   ;;  %s3124_s4 = inlined_call_operand.vmem [shape: bf16[128,128], index: 4, kind: input, shape index: {}]   ;;  %s3125_s5 = inlined_call_operand.vmem [shape: f32[1,128], index: 5, kind: input, shape index: {}]   ;;  %s3126_s6 = inlined_call_operand.vmem [shape: f32[1,128], index: 6, kind: input, shape index: {}]   ;;  %s3127_s7 = inlined_call_operand.vmem [shape: f32[1,128], index: 7, kind: input, shape index: {}]   ;;  %s3128_s8 = inlined_call_operand.vmem [shape: bf16[128,256], index: 8, kind: input, shape index: {}]   ;;  %s3129_s9 = inlined_call_operand.vmem [shape: f32[1,256], index: 9, kind: input, shape index: {}]   ;;  %s3130_s10 = inlined_call_operand.vmem [shape: bf16[256,128], index: 10, kind: input, shape index: {}]   ;;  %s3131_s11 = inlined_call_operand.vmem [shape: f32[1,128], index: 11, kind: input, shape index: {}]   ;;  %s3132_s12 = inlined_call_operand.vmem [shape: f32[1,128], index: 12, kind: input, shape index: {}]   ;;  %s3133_s13 = inlined_call_operand.vmem [shape: f32[1,128], index: 13, kind: input, shape index: {}]   ;;  %s3134_s14 = inlined_call_operand.vmem [shape: f32[2,12,128], index: 14, kind: output, shape index: {}]  }
   0x1   :  { %s2640_s15 = smov 0  }
   0x2 LB: > { %s36_s16 = sadd.s32 1, %s2547_s30  ;;  %p1986_p0 = scmp.ge.s32.totalorder %s2551_s15, 1  ;;  %s2551_s15 = sphi %s2640_s15, %s24_s15   ;;  %s2547_s30 = sphi %s2638_s30, %s3136_s30   ;;  %s2543_s29 = sphi %s2636_s29, %s3135_s29  }
   0x3   : > { %p38_p1 = scmp.ge.s32.totalorder %s36_s16, 2  ;;  %p470_p2 = scmp.lt.s32.totalorder %s2551_s15, 3 }
   0x5   : > { %s3138_s16 = smov (%p38_p1, %s36_s16), 0  ;;  %p471_p3 = pnand %p1986_p0, %p470_p2 }
   0x6   : > { %p544_p4 = scmp.lt.s32.totalorder (!%p471_p3), %s2543_s29, 1  ;;  %s2553_s27 = smov (!%p471_p3), 16  }
   0x7   : > { %474 = sbr.rel (%p471_p3) target bundleno = 1741 (0x6cd), region = 76  ;;  %s2554_s28 = smov (!%p471_p3), 48  }
   0x8   : > { %s2556_s18 = smov (!%p471_p3), 80   ;;  %s2557_s19 = smov (!%p471_p3), 64  }
   0x9   : > { %s2559_s21 = smov (!%p471_p3), 96  }
   0xc   : > { %s3140_s29 = smov (!%p544_p4, %s2543_s29), 1  ;;  %vm603_vm0 = vcmask 130048   ;;  %vm621_vm1 = vcmask 97280   ;;  %vm625_vm2 = vcmask 93184   ;;  %vm654_vm3 = vcmask 1045504  }
   0xd   : > { %s2657_s17 = sshll.u32 %s3140_s29, 6  ;;  %vm1325_vm4 = vcmask 261120   ;;  %vm1328_vm5 = vcmask 392192   ;;  %vm1331_vm6 = vcmask 523264   ;;  %vm1334_vm7 = vcmask 654336  }
   0xe   : > { %s2663_s20 = scalar_lea.vmem %s3122_s2, %s2657_s17  ;;  %s2669_s23 = scalar_lea.vmem %s3121_s1, %s2657_s17  ;;  %vm1337_vm8 = vcmask 785408   ;;  %vm1340_vm9 = vcmask 916480   ;;  %vm1432_vm10 = vcmask 1043456  }
   0xf   : > { %v2319_v0 = vld [vmem:[%s2663_s20] sm:$0xff]  ;;  %v2322_v1 = vld [vmem:[%s2663_s20 + $0x8] sm:$0xff]  ;;  %v2325_v8 = vld [vmem:[%s2663_s20 + $0x10] sm:$0xff]  ;;  %s2830_s26 = scalar_lea.vmem %s3123_s3, %s2657_s17  ;;  %s2555_s17 = smov 32  }
  0x10   : > { %v1999_v2 = vld [vmem:[%s2669_s23] sm:$0xf]  ;;  %v2318_v3 = vld [vmem:[%s2669_s23] sm:$0x30]  ;;  %v2019_v4 = vld [vmem:[%s2669_s23 + $0x8] sm:$0xf]  ;;  %614 = vmatpush.bf16.msra.mxu1 %v2319_v0  ;;  %702 = vmatpush.bf16.msra.mxu2 %v2322_v1 }
  0x11   : > { %v2321_v5 = vld [vmem:[%s2669_s23 + $0x8] sm:$0x30]  ;;  %v2000_v6 = vor.u32 %v2318_v3, %v1999_v2  ;;  %v2039_v9 = vld [vmem:[%s2669_s23 + $0x10] sm:$0xf]  ;;  %v2324_v10 = vld [vmem:[%s2669_s23 + $0x10] sm:$0x30]  ;;  %787 = vmatpush.bf16.msra.mxu0 %v2325_v8 }
  0x12   : > { %v2020_v7 = vor.u32 %v2321_v5, %v2019_v4  ;;  %v2040_v11 = vor.u32 %v2324_v10, %v2039_v9  ;;  %v2328_v12 = vld [vmem:[%s2663_s20 + $0x18] sm:$0xff]  ;;  %v2331_v13 = vld [vmem:[%s2663_s20 + $0x20] sm:$0xff]  ;;  %v2334_v14 = vld [vmem:[%s2663_s20 + $0x28] sm:$0xff] }
  0x13   : > { %2005 = vmatmul.msk.bf16.vlgmr.msra.gmra.mxu1 %vm603_vm0, %v2000_v6  ;;  %v2059_v15 = vld [vmem:[%s2669_s23 + $0x18] sm:$0xf]  ;;  %v2327_v16 = vld [vmem:[%s2669_s23 + $0x18] sm:$0x30]  ;;  %v2079_v17 = vld [vmem:[%s2669_s23 + $0x20] sm:$0xf] }
  0x14   : > { %2025 = vmatmul.msk.bf16.vlgmr.msra.gmra.mxu2 %vm603_vm0, %v2020_v7  ;;  %2045 = vmatmul.msk.bf16.vlgmr.msra.gmra.mxu0 %vm603_vm0, %v2040_v11  ;;  %v2330_v18 = vld [vmem:[%s2669_s23 + $0x20] sm:$0x30]  ;;  %v2060_v19 = vor.u32 %v2327_v16, %v2059_v15  ;;  %v2340_v20 = vld [vmem:[%s2663_s20 + $0x38] sm:$0xff]  ;;  %v2337_v22 = vld [vmem:[%s2663_s20 + $0x30] sm:$0xff]  ;;  %s2558_s20 = smov 112  }
  0x15   : > { %872 = vmatpush.bf16.msrb.mxu2 %v2328_v12  ;;  %957 = vmatpush.bf16.msrb.mxu0 %v2331_v13  ;;  %v2080_v21 = vor.u32 %v2330_v18, %v2079_v17  ;;  %v2099_v23 = vld [vmem:[%s2669_s23 + $0x28] sm:$0xf]  ;;  %v2333_v24 = vld [vmem:[%s2669_s23 + $0x28] sm:$0x30]  ;;  %v2119_v25 = vld [vmem:[%s2669_s23 + $0x30] sm:$0xf] }
  0x16   : > { %v2336_v26 = vld [vmem:[%s2669_s23 + $0x30] sm:$0x30]  ;;  %v2100_v27 = vor.u32 %v2333_v24, %v2099_v23  ;;  %v2139_v29 = vld [vmem:[%s2669_s23 + $0x38] sm:$0xf]  ;;  %v2339_v30 = vld [vmem:[%s2669_s23 + $0x38] sm:$0x30] }
  0x17   : > { %v2120_v28 = vor.u32 %v2336_v26, %v2119_v25  ;;  %v2140_v31 = vor.u32 %v2339_v30, %v2139_v29 }
  0x19   : > { %1042 = vmatpush.bf16.msra.mxu2 %v2334_v14  ;;  %1127 = vmatpush.bf16.msra.mxu0 %v2337_v22 }
  0x24   : > { %2065 = vmatmul.msk.bf16.vlgmr.msrb.gmra.mxu2 %vm603_vm0, %v2060_v19  ;;  %2085 = vmatmul.msk.bf16.vlgmr.msrb.gmra.mxu0 %vm603_vm0, %v2080_v21 }
  0x25   : > { %1212 = vmatpush.bf16.msrb.mxu2 %v2340_v20 }
  0x34   : > { %2105 = vmatmul.msk.bf16.vlgmr.msra.gmra.mxu2 %vm603_vm0, %v2100_v27  ;;  %2125 = vmatmul.msk.bf16.vlgmr.msra.gmra.mxu0 %vm603_vm0, %v2120_v28 }
  0x44   : > { %2145 = vmatmul.msk.bf16.vlgmr.msrb.gmra.mxu2 %vm603_vm0, %v2140_v31 }
  0x90   : > { %v2703_v32 = vpop.f32.mrf.mxu1 }
  0x91   : > { %v622_v33 = vsel %vm621_vm1, %v2703_v32, -inf  ;;  %v2707_v34 = vpop.f32.mrf.mxu0 }
  0x92   : > { %623 = vmax.xlane.f32.xlu1 %v622_v33  ;;  %v794_v44 = vsel %vm621_vm1, %v2707_v34, -inf }
  0x97   : > { %v704_v35 = vpop.f32.mrf.mxu2 }
  0x98   : > { %v709_v36 = vsel %vm621_vm1, %v704_v35, -inf  ;;  %v618_v37 = vpop.f32.mrf.mxu1 }
  0x99   : > { %710 = vmax.xlane.f32.xlu0 %v709_v36  ;;  %v626_v38 = vsel %vm625_vm2, %v618_v37, -inf  ;;  %v2711_v39 = vpop.f32.mrf.mxu0 }
  0x9a   : > { %627 = vmax.xlane.f32.xlu1 %v626_v38  ;;  %v797_v42 = vsel %vm625_vm2, %v2711_v39, -inf }
  0x9f   : > { %v706_v40 = vpop.f32.mrf.mxu2 }
  0xa0   : > { %v712_v41 = vsel %vm625_vm2, %v706_v40, -inf }
  0xa1   : > { %713 = vmax.xlane.f32.xlu0 %v712_v41  ;;  %v2716_v43 = vpop.f32.mrf.mxu0 }
  0xa2   : > { %798 = vmax.xlane.f32.xlu1 %v797_v42  ;;  %v964_v47 = vsel %vm621_vm1, %v2716_v43, -inf }
  0xa7   : > { %v874_v45 = vpop.f32.mrf.mxu2 }
  0xa8   : > { %v879_v46 = vsel %vm621_vm1, %v874_v45, -inf }
  0xa9   : > { %880 = vmax.xlane.f32.xlu2 %v879_v46  ;;  %795 = vmax.xlane.f32.xlu0 %v794_v44  ;;  %v2731_v52 = vpop.f32.mrf.mxu0 }
  0xaa   : > { %965 = vmax.xlane.f32.xlu1 %v964_v47  ;;  %v967_v53 = vsel %vm625_vm2, %v2731_v52, -inf }
  0xaf   : > { %v2723_v48 = vpop.f32.mrf.mxu2 }
  0xb0   : > { %v882_v49 = vsel %vm625_vm2, %v2723_v48, -inf }
  0xb1   : > { %883 = vmax.xlane.f32.xlu2 %v882_v49  ;;  %v2747_v60 = vpop.f32.mrf.mxu0 }
  0xb2   : > { %v1134_v61 = vsel %vm621_vm1, %v2747_v60, -inf }
  0xb7   : > { %v2727_v50 = vpop.f32.mrf.mxu2 }
  0xb8   : > { %v1049_v51 = vsel %vm621_vm1, %v2727_v50, -inf }
  0xb9   : > { %1050 = vmax.xlane.f32.xlu2 %v1049_v51  ;;  %v2760_v17 = vpop.f32.mrf.mxu0 }
  0xba   : > { %v1137_v24 = vsel %vm625_vm2, %v2760_v17, -inf }
  0xbf   : > { %v2735_v54 = vpop.f32.mrf.mxu2 }
  0xc0   : > { %v1052_v55 = vsel %vm625_vm2, %v2735_v54, -inf }
  0xc1   : > { %968 = vmax.xlane.f32.xlu2 %v967_v53  ;;  %1053 = vmax.xlane.f32.xlu0 %v1052_v55 }
  0xc7   : > { %v2739_v56 = vpop.f32.mrf.mxu2 }
  0xc8   : > { %v1219_v57 = vsel %vm621_vm1, %v2739_v56, -inf }
  0xc9   : > { %1220 = vmax.xlane.f32.xlu0 %v1219_v57 }
  0xcf   : > { %v2743_v58 = vpop.f32.mrf.mxu2 }
  0xd0   : > { %v1222_v59 = vsel %vm625_vm2, %v2743_v58, -inf }
  0xd1   : > { %1223 = vmax.xlane.f32.xlu1 %v1222_v59 }
  0xd9   : > { %1135 = vmax.xlane.f32.xlu1 %v1134_v61 }
 0x105   : > { %v624_v62 = vpop.xlane.xlu1 %623 }
 0x106   : > { %v629_v8 = vsub.f32 %v2703_v32, %v624_v62 }
 0x108   : > { %v631_v14 = vmul.f32 1.442695, %v629_v8 }
 0x10c   : > { %v711_v63 = vpop.xlane.xlu0 %710 }
 0x10d   : > { %v715_v0 = vsub.f32 %v704_v35, %v711_v63  ;;  %v628_v1 = vpop.xlane.xlu1 %627 }
 0x10e   : > { %v630_v3 = vsub.f32 %v618_v37, %v628_v1 }
 0x10f   : > { %v717_v2 = vmul.f32 1.442695, %v715_v0 }
 0x110   : > { %v633_v4 = vmul.f32 1.442695, %v630_v3 }
 0x111   : > { %2455 = vpow2.f32 %v717_v2 }
 0x112   : > { %2457 = vpow2.f32 %v633_v4 }
 0x114   : > { %v714_v5 = vpop.xlane.xlu0 %713 }
 0x115   : > { %v716_v6 = vsub.f32 %v706_v40, %v714_v5  ;;  %v799_v12 = vpop.xlane.xlu1 %798 }
 0x116   : > { %v801_v21 = vsub.f32 %v2711_v39, %v799_v12 }
 0x117   : > { %v2751_v7 = vpop.eup %2455  ;;  %v719_v9 = vmul.f32 1.442695, %v716_v6 }
 0x118   : > { %v721_v10 = vsel %vm621_vm1, %v2751_v7, 0.0  ;;  %v2756_v11 = vpop.eup %2457  ;;  %v804_v26 = vmul.f32 1.442695, %v801_v21 }
 0x119   : > { %2459 = vpow2.f32 %v719_v9  ;;  %722 = vadd.xlane.f32.xlu2 %v721_v10  ;;  %v638_v13 = vsel %vm625_vm2, %v2756_v11, 0.0 }
 0x11a   : > { %639 = vadd.xlane.f32.xlu1 %v638_v13  ;;  %2461 = vpow2.f32 %v631_v14  ;;  %v2323_v14 = vld [vmem:[%s2830_s26 + $0x8] sm:$0x30] }
 0x11c   : > { %v881_v15 = vpop.xlane.xlu2 %880  ;;  %v796_v16 = vpop.xlane.xlu0 %795 }
 0x11d   : > { %v885_v18 = vsub.f32 %v874_v45, %v881_v15  ;;  %v800_v19 = vsub.f32 %v2707_v34, %v796_v16  ;;  %v966_v27 = vpop.xlane.xlu1 %965 }
 0x11e   : > { %v970_v32 = vsub.f32 %v2716_v43, %v966_v27 }
 0x11f   : > { %v2763_v20 = vpop.eup %2459  ;;  %v887_v22 = vmul.f32 1.442695, %v885_v18  ;;  %v802_v23 = vmul.f32 1.442695, %v800_v19  ;;  %v2008_v18 = vld [vmem:[%s2830_s26] sm:$0xf] }
 0x120   : > { %v724_v25 = vsel %vm625_vm2, %v2763_v20, 0.0  ;;  %v2770_v29 = vpop.eup %2461  ;;  %v972_v38 = vmul.f32 1.442695, %v970_v32  ;;  %v2320_v19 = vld [vmem:[%s2830_s26] sm:$0x30] }
 0x121   : > { %2463 = vpow2.f32 %v887_v22  ;;  %1138 = vmax.xlane.f32.xlu2 %v1137_v24  ;;  %725 = vadd.xlane.f32.xlu0 %v724_v25  ;;  %v635_v36 = vsel %vm621_vm1, %v2770_v29, 0.0  ;;  %v2009_v21 = vor.u32 %v2320_v19, %v2008_v18  ;;  %v2329_v24 = vld [vmem:[%s2830_s26 + $0x18] sm:$0x30] }
 0x122   : > { %2465 = vpow2.f32 %v802_v23  ;;  %v2068_v23 = vld [vmem:[%s2830_s26 + $0x18] sm:$0xf] }
 0x123   : > { %2467 = vpow2.f32 %v804_v26  ;;  %v656_v22 = vsel %vm654_vm3, %v2009_v21, 0  ;;  %v2069_v26 = vor.u32 %v2329_v24, %v2068_v23  ;;  %v2338_v23 = vld [vmem:[%s2830_s26 + $0x30] sm:$0x30] }
 0x124   : > { %v884_v28 = vpop.xlane.xlu2 %883  ;;  %665 = vmatpush.bf16.msrb.mxu1 %v656_v22  ;;  %v2128_v22 = vld [vmem:[%s2830_s26 + $0x30] sm:$0xf] }
 0x125   : > { %v886_v30 = vsub.f32 %v2723_v48, %v884_v28  ;;  %v911_v27 = vsel %vm654_vm3, %v2069_v26, 0  ;;  %v2048_v28 = vld [vmem:[%s2830_s26 + $0x10] sm:$0xf] }
 0x127   : > { %v2773_v31 = vpop.eup %2463  ;;  %v889_v33 = vmul.f32 1.442695, %v886_v30  ;;  %v2326_v30 = vld [vmem:[%s2830_s26 + $0x10] sm:$0x30] }
 0x128   : > { %v2776_v34 = vpop.eup %2465  ;;  %v891_v35 = vsel %vm621_vm1, %v2773_v31, 0.0 }
 0x129   : > { %2469 = vpow2.f32 %v889_v33  ;;  %892 = vadd.xlane.f32.xlu2 %v891_v35  ;;  %636 = vadd.xlane.f32.xlu0 %v635_v36  ;;  %v806_v37 = vsel %vm621_vm1, %v2776_v34, 0.0  ;;  %v2784_v40 = vpop.eup %2467  ;;  %v2049_v35 = vor.u32 %v2326_v30, %v2048_v28 }
 0x12a   : > { %807 = vadd.xlane.f32.xlu1 %v806_v37  ;;  %2471 = vpow2.f32 %v972_v38  ;;  %v809_v45 = vsel %vm625_vm2, %v2784_v40, 0.0 }
 0x12b   : > { %v826_v37 = vsel %vm654_vm3, %v2049_v35, 0 }
 0x12c   : > { %v1051_v39 = vpop.xlane.xlu2 %1050  ;;  %835 = vmatpush.bf16.msra.mxu1 %v826_v37 }
 0x12d   : > { %v1055_v41 = vsub.f32 %v2727_v50, %v1051_v39 }
 0x12f   : > { %v2787_v42 = vpop.eup %2469  ;;  %v1057_v43 = vmul.f32 1.442695, %v1055_v41 }
 0x130   : > { %v894_v44 = vsel %vm625_vm2, %v2787_v42, 0.0  ;;  %v2793_v48 = vpop.eup %2471 }
 0x131   : > { %2473 = vpow2.f32 %v1057_v43  ;;  %895 = vadd.xlane.f32.xlu0 %v894_v44  ;;  %810 = vadd.xlane.f32.xlu2 %v809_v45  ;;  %v976_v59 = vsel %vm621_vm1, %v2793_v48, 0.0  ;;  %v2108_v44 = vld [vmem:[%s2830_s26 + $0x28] sm:$0xf]  ;;  %v2335_v45 = vld [vmem:[%s2830_s26 + $0x28] sm:$0x30] }
 0x134   : > { %v969_v46 = vpop.xlane.xlu2 %968  ;;  %v1054_v47 = vpop.xlane.xlu0 %1053 }
 0x135   : > { %v971_v49 = vsub.f32 %v2731_v52, %v969_v46  ;;  %v1056_v50 = vsub.f32 %v2735_v54, %v1054_v47 }
 0x137   : > { %v2797_v51 = vpop.eup %2473  ;;  %v974_v53 = vmul.f32 1.442695, %v971_v49  ;;  %v1059_v55 = vmul.f32 1.442695, %v1056_v50 }
 0x138   : > { %v1061_v57 = vsel %vm621_vm1, %v2797_v51, 0.0 }
 0x139   : > { %2475 = vpow2.f32 %v974_v53  ;;  %1062 = vadd.xlane.f32.xlu0 %v1061_v57  ;;  %977 = vadd.xlane.f32.xlu2 %v976_v59 }
 0x13a   : > { %2477 = vpow2.f32 %v1059_v55 }
 0x13c   : > { %v1221_v61 = vpop.xlane.xlu0 %1220 }
 0x13d   : > { %v1225_v62 = vsub.f32 %v2739_v56, %v1221_v61 }
 0x13f   : > { %v2804_v52 = vpop.eup %2475  ;;  %v1227_v54 = vmul.f32 1.442695, %v1225_v62  ;;  %v2332_v62 = vld [vmem:[%s2830_s26 + $0x20] sm:$0x30] }
 0x140   : > { %v2806_v63 = vpop.eup %2477  ;;  %v979_v0 = vsel %vm625_vm2, %v2804_v52, 0.0 }
 0x141   : > { %2479 = vpow2.f32 %v1227_v54  ;;  %980 = vadd.xlane.f32.xlu0 %v979_v0  ;;  %v1064_v1 = vsel %vm625_vm2, %v2806_v63, 0.0 }
 0x142   : > { %1065 = vadd.xlane.f32.xlu1 %v1064_v1 }
 0x144   : > { %v1224_v2 = vpop.xlane.xlu1 %1223 }
 0x145   : > { %v1226_v3 = vsub.f32 %v2743_v58, %v1224_v2 }
 0x147   : > { %v2813_v4 = vpop.eup %2479  ;;  %v1229_v56 = vmul.f32 1.442695, %v1226_v3 }
 0x148   : > { %v1231_v5 = vsel %vm621_vm1, %v2813_v4, 0.0 }
 0x149   : > { %2481 = vpow2.f32 %v1229_v56 }
 0x14a   : > { %1232 = vadd.xlane.f32.xlu1 %v1231_v5 }
 0x14c   : > { %v1136_v6 = vpop.xlane.xlu1 %1135 }
 0x14d   : > { %v1140_v8 = vsub.f32 %v2747_v60, %v1136_v6  ;;  %v2028_v60 = vld [vmem:[%s2830_s26 + $0x8] sm:$0xf] }
 0x14e   : > { %v2029_v15 = vor.u32 %v2323_v14, %v2028_v60 }
 0x14f   : > { %v2818_v9 = vpop.eup %2481  ;;  %v1142_v10 = vmul.f32 1.442695, %v1140_v8 }
 0x150   : > { %v1234_v12 = vsel %vm625_vm2, %v2818_v9, 0.0  ;;  %v741_v16 = vsel %vm654_vm3, %v2029_v15, 0 }
 0x151   : > { %2483 = vpow2.f32 %v1142_v10  ;;  %1235 = vadd.xlane.f32.xlu2 %v1234_v12  ;;  %750 = vmatpush.bf16.msra.mxu3 %v741_v16  ;;  %v2148_v12 = vld [vmem:[%s2830_s26 + $0x38] sm:$0xf] }
 0x155   : > { %920 = vmatpush.bf16.msrb.mxu3 %v911_v27 }
 0x157   : > { %v2822_v58 = vpop.eup %2483 }
 0x158   : > { %v1146_v13 = vsel %vm621_vm1, %v2822_v58, 0.0 }
 0x159   : > { %1147 = vadd.xlane.f32.xlu0 %v1146_v13  ;;  %v2341_v13 = vld [vmem:[%s2830_s26 + $0x38] sm:$0x30] }
 0x15a   : > { %v2149_v60 = vor.u32 %v2341_v13, %v2148_v12 }
 0x15c   : > { %v1251_v16 = vsel %vm654_vm3, %v2149_v60, 0  ;;  %v2348_v60 = vld [vmem:[%s3124_s4 + $0x30] sm:$0xff] }
 0x18c   : > { %v723_v25 = vpop.xlane.xlu2 %722 }
 0x18d   : > { %2485 = vrcp.f32 %v723_v25  ;;  %v640_v41 = vpop.xlane.xlu1 %639  ;;  %v2129_v25 = vor.u32 %v2338_v23, %v2128_v22 }
 0x18f   : > { %v1166_v27 = vsel %vm654_vm3, %v2129_v25, 0 }
 0x193   : > { %v2486_v39 = vpop.eup %2485 }
 0x194   : > { %v1139_v32 = vpop.xlane.xlu2 %1138  ;;  %v726_v33 = vpop.xlane.xlu0 %725  ;;  %v729_v47 = vmul.f32 %v2486_v39, %v2751_v7  ;;  %v2088_v7 = vld [vmem:[%s2830_s26 + $0x20] sm:$0xf]  ;;  %s2313_s26 = sshll.u32 %s3140_s29, 4 }
 0x195   : > { %v1141_v36 = vsub.f32 %v2760_v17, %v1139_v32  ;;  %2487 = vrcp.f32 %v726_v33  ;;  %v2109_v17 = vor.u32 %v2335_v45, %v2108_v44  ;;  %v2089_v0 = vor.u32 %v2332_v62, %v2088_v7 }
 0x197   : > { %v1144_v38 = vmul.f32 1.442695, %v1141_v36  ;;  %v1081_v55 = vsel %vm654_vm3, %v2109_v17, 0  ;;  %v996_v5 = vsel %vm654_vm3, %v2089_v0, 0 }
 0x199   : > { %2489 = vpow2.f32 %v1144_v38 }
 0x19a   : > { %2491 = vrcp.f32 %v640_v41 }
 0x19b   : > { %v2488_v43 = vpop.eup %2487 }
 0x19c   : > { %v637_v46 = vpop.xlane.xlu0 %636  ;;  %v730_v49 = vmul.f32 %v2488_v43, %v2763_v20  ;;  %v893_v50 = vpop.xlane.xlu2 %892 }
 0x19d   : > { %2493 = vrcp.f32 %v637_v46  ;;  %v808_v8 = vpop.xlane.xlu1 %807 }
 0x19e   : > { %v731_v53 = vpack.c.bf16 %v730_v49, %v729_v47  ;;  %2495 = vrcp.f32 %v893_v50 }
 0x19f   : > { %v2850_v57 = vpop.eup %2489 }
 0x1a0   : > { %2030 = vmatmul.msk.bf16.vlgmr.msra.gmra.mxu3 %vm621_vm1, %v731_v53  ;;  %v1149_v59 = vsel %vm625_vm2, %v2850_v57, 0.0  ;;  %v2492_v61 = vpop.eup %2491 }
 0x1a1   : > { %1150 = vadd.xlane.f32.xlu1 %v1149_v59  ;;  %1090 = vmatpush.bf16.msra.mxu3 %v1081_v55  ;;  %v644_v1 = vmul.f32 %v2492_v61, %v2756_v11 }
 0x1a3   : > { %v2494_v20 = vpop.eup %2493 }
 0x1a4   : > { %v896_v54 = vpop.xlane.xlu0 %895  ;;  %v643_v2 = vmul.f32 %v2494_v20, %v2770_v29  ;;  %v811_v3 = vpop.xlane.xlu2 %810 }
 0x1a5   : > { %2497 = vrcp.f32 %v896_v54  ;;  %v2496_v6 = vpop.eup %2495 }
 0x1a6   : > { %v645_v56 = vpack.c.bf16 %v644_v1, %v643_v2  ;;  %2499 = vrcp.f32 %v811_v3  ;;  %v899_v11 = vmul.f32 %v2496_v6, %v2773_v31 }
 0x1a7   : > { %2501 = vrcp.f32 %v808_v8 }
 0x1a8   : > { %2010 = vmatmul.msk.bf16.vlgmr.msrb.gmra.mxu1 %vm621_vm1, %v645_v56 }
 0x1a9   : > { %1005 = vmatpush.bf16.msrb.mxu1 %v996_v5 }
 0x1ab   : > { %v2498_v10 = vpop.eup %2497 }
 0x1ac   : > { %v900_v29 = vmul.f32 %v2498_v10, %v2787_v42  ;;  %v1063_v14 = vpop.xlane.xlu0 %1062  ;;  %v2500_v18 = vpop.eup %2499 }
 0x1ad   : > { %v2502_v19 = vpop.eup %2501  ;;  %v815_v21 = vmul.f32 %v2500_v18, %v2784_v40  ;;  %2503 = vrcp.f32 %v1063_v14  ;;  %v978_v28 = vpop.xlane.xlu2 %977  ;;  %v2347_v14 = vld [vmem:[%s3124_s4 + $0x28] sm:$0xff]  ;;  %v2344_v18 = vld [vmem:[%s3124_s4 + $0x10] sm:$0xff] }
 0x1ae   : > { %v901_v15 = vpack.c.bf16 %v900_v29, %v899_v11  ;;  %v814_v31 = vmul.f32 %v2502_v19, %v2776_v34  ;;  %v2349_v29 = vld [vmem:[%s3124_s4 + $0x38] sm:$0xff]  ;;  %v2343_v19 = vld [vmem:[%s3124_s4 + $0x8] sm:$0xff] }
 0x1af   : > { %1412 = vmatpush.bf16.msrb.mxu0 %v2349_v29 }
 0x1b0   : > { %2070 = vmatmul.msk.bf16.vlgmr.msrb.gmra.mxu3 %vm621_vm1, %v901_v15  ;;  %v816_v42 = vpack.c.bf16 %v815_v21, %v814_v31  ;;  %v2346_v15 = vld [vmem:[%s3124_s4 + $0x20] sm:$0xff] }
 0x1b1   : > { %1260 = vmatpush.bf16.msrb.mxu3 %v1251_v16  ;;  %v2345_v16 = vld [vmem:[%s3124_s4 + $0x18] sm:$0xff]  ;;  %v2342_v21 = vld [vmem:[%s3124_s4] sm:$0xff] }
 0x1b3   : > { %v2504_v30 = vpop.eup %2503  ;;  %1413 = vmatpush.bf16.msrb.mxu0 %v2348_v60 }
 0x1b4   : > { %v981_v26 = vpop.xlane.xlu0 %980  ;;  %v1069_v40 = vmul.f32 %v2504_v30, %v2797_v51 }
 0x1b5   : > { %v1066_v24 = vpop.xlane.xlu1 %1065 }
 0x1b6   : > { %2505 = vrcp.f32 %v1066_v24 }
 0x1b7   : > { %2507 = vrcp.f32 %v981_v26  ;;  %1414 = vmatpush.bf16.msrb.mxu0 %v2347_v14 }
 0x1b8   : > { %2050 = vmatmul.msk.bf16.vlgmr.msra.gmra.mxu1 %vm621_vm1, %v816_v42  ;;  %2509 = vrcp.f32 %v978_v28 }
 0x1b9   : > { %1175 = vmatpush.bf16.msra.mxu1 %v1166_v27 }
 0x1bb   : > { %1415 = vmatpush.bf16.msrb.mxu0 %v2346_v15 }
 0x1bc   : > { %v2506_v32 = vpop.eup %2505 }
 0x1bd   : > { %v1070_v33 = vmul.f32 %v2506_v32, %v2806_v63  ;;  %v2508_v35 = vpop.eup %2507  ;;  %v1233_v36 = vpop.xlane.xlu1 %1232 }
 0x1be   : > { %v2510_v37 = vpop.eup %2509  ;;  %v985_v38 = vmul.f32 %v2508_v35, %v2804_v52  ;;  %2511 = vrcp.f32 %v1233_v36 }
 0x1bf   : > { %v1071_v34 = vpack.c.bf16 %v1070_v33, %v1069_v40  ;;  %v984_v41 = vmul.f32 %v2510_v37, %v2793_v48  ;;  %1416 = vmatpush.bf16.msrb.mxu0 %v2345_v16 }
 0x1c1   : > { %2110 = vmatmul.msk.bf16.vlgmr.msra.gmra.mxu3 %vm621_vm1, %v1071_v34  ;;  %v986_v43 = vpack.c.bf16 %v985_v38, %v984_v41 }
 0x1c3   : > { %1417 = vmatpush.bf16.msrb.mxu0 %v2344_v18 }
 0x1c4   : > { %v1236_v39 = vpop.xlane.xlu2 %1235  ;;  %v2512_v44 = vpop.eup %2511 }
 0x1c5   : > { %2513 = vrcp.f32 %v1236_v39  ;;  %v1239_v63 = vmul.f32 %v2512_v44, %v2813_v4 }
 0x1c7   : > { %1418 = vmatpush.bf16.msrb.mxu0 %v2343_v19  ;;  %v2241_v19 = vld [vmem:[%s3128_s8 + $0x70] sm:$0xf] }
 0x1c8   : > { %2090 = vmatmul.msk.bf16.vlgmr.msrb.gmra.mxu1 %vm621_vm1, %v986_v43 }
 0x1cb   : > { %v2514_v51 = vpop.eup %2513  ;;  %1419 = vmatpush.bf16.msrb.mxu0 %v2342_v21  ;;  %v2365_v21 = vld [vmem:[%s3128_s8 + $0x74] sm:$0xf0] }
 0x1cc   : > { %v1240_v45 = vmul.f32 %v2514_v51, %v2818_v9  ;;  %v1148_v47 = vpop.xlane.xlu0 %1147 }
 0x1cd   : > { %2515 = vrcp.f32 %v1148_v47 }
 0x1ce   : > { %v1241_v46 = vpack.c.bf16 %v1240_v45, %v1239_v63 }
 0x1d1   : > { %2150 = vmatmul.msk.bf16.vlgmr.msrb.gmra.mxu3 %vm621_vm1, %v1241_v46 }
 0x1d3   : > { %v2516_v49 = vpop.eup %2515 }
 0x1d4   : > { %v1154_v48 = vmul.f32 %v2516_v49, %v2822_v58 }
 0x214   : > { %v1151_v52 = vpop.xlane.xlu1 %1150 }
 0x215   : > { %2517 = vrcp.f32 %v1151_v52 }
 0x21b   : > { %v2518_v17 = vpop.eup %2517 }
 0x21c   : > { %v1155_v50 = vmul.f32 %v2518_v17, %v2850_v57 }
 0x21e   : > { %v1156_v53 = vpack.c.bf16 %v1155_v50, %v1154_v48 }
 0x220   : > { %2130 = vmatmul.msk.bf16.vlgmr.msra.gmra.mxu1 %vm621_vm1, %v1156_v53 }
 0x223   : > { %v752_v55 = vpop.f32.mrf.mxu3 }
 0x225   : > { %v667_v4 = vpop.f32.mrf.mxu1 }
 0x22b   : > { %v754_v59 = vpop.f32.mrf.mxu3 }
 0x22c   : > { %v2414_v9 = vpack.i.bf16 %v754_v59, %v752_v55 }
 0x22d   : > { %v669_v61 = vpop.f32.mrf.mxu1 }
 0x22e   : > { %2415 = vrot.lane.b32.xlu2 %v2414_v9, %s2553_s27  ;;  %v2449_v9 = vld [vmem:[%s3125_s5] ss:$0 sm:$0xff] }
 0x233   : > { %v922_v7 = vpop.f32.mrf.mxu3 }
 0x235   : > { %v837_v62 = vpop.f32.mrf.mxu1 }
 0x23b   : > { %v924_v20 = vpop.f32.mrf.mxu3 }
 0x23c   : > { %v2424_v54 = vpack.i.bf16 %v924_v20, %v922_v7 }
 0x23d   : > { %v839_v0 = vpop.f32.mrf.mxu1 }
 0x23e   : > { %2425 = vrot.lane.b32.xlu1 %v2424_v54, %s2554_s28  ;;  %v2419_v58 = vpack.i.bf16 %v839_v0, %v837_v62 }
 0x240   : > { %2420 = vrot.lane.b32.xlu0 %v2419_v58, %s2555_s17 }
 0x244   : > { %v1092_v57 = vpop.f32.mrf.mxu3 }
 0x245   : > { %v1007_v1 = vpop.f32.mrf.mxu1 }
 0x24c   : > { %v1094_v2 = vpop.f32.mrf.mxu3 }
 0x24d   : > { %v2434_v3 = vpack.i.bf16 %v1094_v2, %v1092_v57  ;;  %v1009_v56 = vpop.f32.mrf.mxu1  ;;  %v2560_v2 = vmov 128.0  }
 0x24e   : > { %v2429_v5 = vpack.i.bf16 %v1009_v56, %v1007_v1  ;;  %2519 = vrcp.f32 %v2560_v2  ;;  %v2187_v2 = vld [vmem:[%s3128_s8 + $0x8] sm:$0xf0] }
 0x24f   : > { %2435 = vrot.lane.b32.xlu0 %v2434_v3, %s2556_s18 }
 0x250   : > { %2430 = vrot.lane.b32.xlu2 %v2429_v5, %s2557_s19  ;;  %s551_s19 = scalar_lea.vmem %s3120_s0, %s2313_s26 }
 0x251   : > { %v584_v7 = vld [vmem:[%s551_s19] sm:$0xff]  ;;  %v585_v0 = vld [vmem:[%s551_s19 + $0x8] sm:$0xf] }
 0x254   : > { %v1262_v6 = vpop.f32.mrf.mxu3  ;;  %v2520_v3 = vpop.eup %2519 }
 0x255   : > { %v1437_v56 = vmul.f32 128.0, %v2520_v3  ;;  %vm1441_vm11 = vweird.f32 %v2520_v3 }
 0x257   : > { %v1438_v5 = vsub.f32 1.0, %v1437_v56 }
 0x25c   : > { %v1264_v8 = vpop.f32.mrf.mxu3 }
 0x25d   : > { %v2444_v10 = vpack.i.bf16 %v1264_v8, %v1262_v6  ;;  %v1439_v6 = vmul.f32 %v2520_v3, %v1438_v5  ;;  %v2373_v5 = vld [vmem:[%s3130_s10 + $0x38] sm:$0xff] }
 0x25e   : > { %1767 = vmatpush.bf16.msra.mxu3 %v2373_v5  ;;  %v2452_v5 = vld [vmem:[%s3131_s11] ss:$0 sm:$0xff] }
 0x25f   : > { %2445 = vrot.lane.b32.xlu1 %v2444_v10, %s2558_s20  ;;  %v1440_v8 = vadd.f32 %v2520_v3, %v1439_v6  ;;  %v2381_v6 = vld [vmem:[%s3130_s10 + $0x78] sm:$0xff]  ;;  %s581_s20 = scalar_lea.vmem %s3134_s14, %s2313_s26 }
 0x260   : > { %1781 = vmatpush.bf16.msra.mxu0 %v2381_v6 }
 0x261   : > { %v2921_v10 = vsel %vm1441_vm11, %v2520_v3, %v1440_v8 }
 0x288   : > { %v2416_v22 = vpop.permute.xlu2 %2415 }
 0x289   : > { %v2417_v31 = vunpack.i.l.bf16 %v2416_v22  ;;  %v2418_v24 = vunpack.i.h.bf16 %v2416_v22  ;;  %v2364_v22 = vld [vmem:[%s3128_s8 + $0x74] sm:$0xf] }
 0x28b   : > { %v1323_v28 = vsel %vm603_vm0, %v667_v4, %v2417_v31  ;;  %v1324_v30 = vsel %vm603_vm0, %v669_v61, %v2418_v24  ;;  %v2243_v31 = vld [vmem:[%s3128_s8 + $0x78] sm:$0xf0] }
 0x28c   : > { %v2246_v24 = vor.u32 %v2364_v22, %v2243_v31  ;;  %v2370_v31 = vld [vmem:[%s3130_s10 + $0x20] sm:$0xff] }
 0x28e   : > { %1607 = vmatpush.bf16.msra.mxu2 %v2246_v24 }
 0x29d   : > { %v1177_v12 = vpop.f32.mrf.mxu1 }
 0x2a5   : > { %v1179_v13 = vpop.f32.mrf.mxu1 }
 0x2a6   : > { %v2439_v11 = vpack.i.bf16 %v1179_v13, %v1177_v12 }
 0x2a8   : > { %2440 = vrot.lane.b32.xlu2 %v2439_v11, %s2559_s21 }
 0x2aa   : > { %v2431_v27 = vpop.permute.xlu2 %2430 }
 0x2ab   : > { %v2432_v37 = vunpack.i.l.bf16 %v2431_v27  ;;  %v2433_v43 = vunpack.i.h.bf16 %v2431_v27 }
 0x2b0   : > { %v2426_v42 = vpop.permute.xlu1 %2425 }
 0x2b1   : > { %v2427_v40 = vunpack.i.l.bf16 %v2426_v42  ;;  %v2428_v35 = vunpack.i.h.bf16 %v2426_v42  ;;  %v2363_v42 = vld [vmem:[%s3128_s8 + $0x64] sm:$0xf0] }
 0x2b2   : > { %v2421_v23 = vpop.permute.xlu0 %2420 }
 0x2b3   : > { %v2422_v25 = vunpack.i.l.bf16 %v2421_v23  ;;  %v2423_v26 = vunpack.i.h.bf16 %v2421_v23  ;;  %v2242_v23 = vor.u32 %v2365_v21, %v2241_v19  ;;  %v2371_v19 = vld [vmem:[%s3130_s10 + $0x28] sm:$0xff] }
 0x2b4   : > { %v2379_v21 = vld [vmem:[%s3130_s10 + $0x68] sm:$0xff] }
 0x2b5   : > { %v1326_v32 = vsel %vm1325_vm4, %v1323_v28, %v2422_v25  ;;  %v1327_v33 = vsel %vm1325_vm4, %v1324_v30, %v2423_v26  ;;  %1593 = vmatpush.bf16.msrb.mxu1 %v2242_v23  ;;  %v2233_v25 = vld [vmem:[%s3128_s8 + $0x60] sm:$0xf]  ;;  %v2362_v26 = vld [vmem:[%s3128_s8 + $0x64] sm:$0xf]  ;;  %v2235_v28 = vld [vmem:[%s3128_s8 + $0x68] sm:$0xf0] }
 0x2b6   : > { %v1329_v36 = vsel %vm1328_vm5, %v1326_v32, %v2427_v40  ;;  %v1330_v38 = vsel %vm1328_vm5, %v1327_v33, %v2428_v35  ;;  %v2234_v27 = vor.u32 %v2363_v42, %v2233_v25  ;;  %v2238_v30 = vor.u32 %v2362_v26, %v2235_v28  ;;  %v2225_v32 = vld [vmem:[%s3128_s8 + $0x50] sm:$0xf]  ;;  %v2361_v40 = vld [vmem:[%s3128_s8 + $0x54] sm:$0xf0]  ;;  %v2360_v33 = vld [vmem:[%s3128_s8 + $0x54] sm:$0xf] }
 0x2b7   : > { %v1332_v51 = vsel %vm1331_vm6, %v1329_v36, %v2432_v37  ;;  %v1333_v45 = vsel %vm1331_vm6, %v1330_v38, %v2433_v43  ;;  %v2227_v35 = vld [vmem:[%s3128_s8 + $0x58] sm:$0xf0]  ;;  %v2217_v37 = vld [vmem:[%s3128_s8 + $0x40] sm:$0xf]  ;;  %v2359_v38 = vld [vmem:[%s3128_s8 + $0x44] sm:$0xf0] }
 0x2b8   : > { %1608 = vmatpush.bf16.msra.mxu2 %v2238_v30  ;;  %v2230_v36 = vor.u32 %v2360_v33, %v2227_v35  ;;  %v2219_v43 = vld [vmem:[%s3128_s8 + $0x48] sm:$0xf0] }
 0x2b9   : > { %1594 = vmatpush.bf16.msrb.mxu1 %v2234_v27 }
 0x2bc   : > { %1609 = vmatpush.bf16.msra.mxu2 %v2230_v36 }
 0x2c1   : > { %v2436_v34 = vpop.permute.xlu0 %2435 }
 0x2c2   : > { %v2438_v39 = vunpack.i.h.bf16 %v2436_v34  ;;  %v2437_v41 = vunpack.i.l.bf16 %v2436_v34  ;;  %v2226_v34 = vor.u32 %v2361_v40, %v2225_v32  ;;  %v2450_v40 = vld [vmem:[%s3126_s6] ss:$0 sm:$0xff] }
 0x2c4   : > { %v1335_v52 = vsel %vm1334_vm7, %v1332_v51, %v2437_v41  ;;  %v1336_v49 = vsel %vm1334_vm7, %v1333_v45, %v2438_v39  ;;  %1595 = vmatpush.bf16.msrb.mxu1 %v2226_v34  ;;  %v2358_v39 = vld [vmem:[%s3128_s8 + $0x44] sm:$0xf]  ;;  %v2218_v41 = vor.u32 %v2359_v38, %v2217_v37  ;;  %v2209_v51 = vld [vmem:[%s3128_s8 + $0x30] sm:$0xf]  ;;  %v2356_v45 = vld [vmem:[%s3128_s8 + $0x34] sm:$0xf] }
 0x2c5   : > { %v2451_v37 = vld [vmem:[%s3127_s7] ss:$0 sm:$0xff] }
 0x2c8   : > { %1596 = vmatpush.bf16.msrb.mxu1 %v2218_v41 }
 0x2d1   : > { %v2446_v44 = vpop.permute.xlu1 %2445 }
 0x2d2   : > { %v2448_v17 = vunpack.i.h.bf16 %v2446_v44  ;;  %v2447_v48 = vunpack.i.l.bf16 %v2446_v44  ;;  %v2222_v44 = vor.u32 %v2358_v39, %v2219_v43 }
 0x2d4   : > { %1610 = vmatpush.bf16.msra.mxu2 %v2222_v44  ;;  %v2368_v44 = vld [vmem:[%s3130_s10 + $0x10] sm:$0xff] }
 0x302   : > { %v2441_v63 = vpop.permute.xlu2 %2440 }
 0x303   : > { %v2443_v46 = vunpack.i.h.bf16 %v2441_v63  ;;  %v2442_v47 = vunpack.i.l.bf16 %v2441_v63  ;;  %v2357_v63 = vld [vmem:[%s3128_s8 + $0x34] sm:$0xf0] }
 0x305   : > { %v1338_v50 = vsel %vm1337_vm8, %v1335_v52, %v2442_v47  ;;  %v1339_v53 = vsel %vm1337_vm8, %v1336_v49, %v2443_v46  ;;  %v2210_v46 = vor.u32 %v2357_v63, %v2209_v51  ;;  %v2211_v47 = vld [vmem:[%s3128_s8 + $0x38] sm:$0xf0]  ;;  %v2201_v49 = vld [vmem:[%s3128_s8 + $0x20] sm:$0xf]  ;;  %v2367_v63 = vld [vmem:[%s3130_s10 + $0x8] sm:$0xff] }
 0x306   : > { %v1341_v55 = vsel %vm1340_vm9, %v1338_v50, %v2447_v48  ;;  %v1342_v4 = vsel %vm1340_vm9, %v1339_v53, %v2448_v17  ;;  %v2214_v52 = vor.u32 %v2356_v45, %v2211_v47  ;;  %v2355_v17 = vld [vmem:[%s3128_s8 + $0x24] sm:$0xf0]  ;;  %v2354_v48 = vld [vmem:[%s3128_s8 + $0x24] sm:$0xf]  ;;  %v2203_v53 = vld [vmem:[%s3128_s8 + $0x28] sm:$0xf0] }
 0x307   : > { %v1343_v59 = vpack.c.bf16 %v1342_v4, %v1341_v55  ;;  %1597 = vmatpush.bf16.msrb.mxu1 %v2210_v46  ;;  %v2202_v50 = vor.u32 %v2355_v17, %v2201_v49  ;;  %v2206_v55 = vor.u32 %v2354_v48, %v2203_v53  ;;  %v2377_v51 = vld [vmem:[%s3130_s10 + $0x58] sm:$0xff]  ;;  %v2376_v45 = vld [vmem:[%s3130_s10 + $0x50] sm:$0xff]  ;;  %v2366_v46 = vld [vmem:[%s3130_s10] sm:$0xff] }
 0x308   : > { %1611 = vmatpush.bf16.msra.mxu2 %v2214_v52  ;;  %v2375_v47 = vld [vmem:[%s3130_s10 + $0x48] sm:$0xff]  ;;  %v2374_v52 = vld [vmem:[%s3130_s10 + $0x40] sm:$0xff] }
 0x309   : > { %1420 = vmatmul.bf16.vlgmr.msrb.gmra.mxu0 %v1343_v59  ;;  %v1507_v49 = vld [vmem:[%s3129_s9] sm:$0x3] }
 0x30a   : > { %v1509_v48 = vperm.slane %v1507_v49, 0 }
 0x30b   : > { %1598 = vmatpush.bf16.msrb.mxu1 %v2202_v50 }
 0x30c   : > { %1612 = vmatpush.bf16.msra.mxu2 %v2206_v55  ;;  %v1510_v55 = vperm.slane %v1507_v49, 1 }
 0x386   : > { %v1421_v61 = vpop.f32.mrf.mxu0 }
 0x387   : > { %v1422_v62 = vadd.f32 %v2449_v9, %v1421_v61  ;;  %v2353_v61 = vld [vmem:[%s3128_s8 + $0x14] sm:$0xf0] }
 0x389   : > { %v1426_v20 = vadd.f32 %v1422_v62, %v584_v7  ;;  %v2352_v7 = vld [vmem:[%s3128_s8 + $0x14] sm:$0xf] }
 0x38b   : > { %1430 = vadd.xlane.f32.xlu2 %v1426_v20 }
 0x38e   : > { %v1423_v54 = vpop.f32.mrf.mxu0 }
 0x38f   : > { %v1424_v58 = vadd.f32 %v2449_v9, %v1423_v54  ;;  %v2193_v9 = vld [vmem:[%s3128_s8 + $0x10] sm:$0xf]  ;;  %v2185_v54 = vld [vmem:[%s3128_s8] sm:$0xf] }
 0x390   : > { %v2194_v62 = vor.u32 %v2353_v61, %v2193_v9 }
 0x391   : > { %v1427_v57 = vadd.f32 %v1424_v58, %v585_v0  ;;  %v2351_v0 = vld [vmem:[%s3128_s8 + $0x4] sm:$0xf0] }
 0x392   : > { %1599 = vmatpush.bf16.msrb.mxu1 %v2194_v62  ;;  %v2186_v3 = vor.u32 %v2351_v0, %v2185_v54 }
 0x393   : > { %v1433_v1 = vsel %vm1432_vm10, %v1427_v57, 0.0 }
 0x394   : > { %1434 = vadd.xlane.f32.xlu0 %v1433_v1  ;;  %v2350_v1 = vld [vmem:[%s3128_s8 + $0x4] sm:$0xf] }
 0x395   : > { %v2190_v56 = vor.u32 %v2350_v1, %v2187_v2 }
 0x396   : > { %1600 = vmatpush.bf16.msrb.mxu1 %v2186_v3 }
 0x3fe   : > { %v1431_v12 = vpop.xlane.xlu2 %1430 }
 0x3ff   : > { %v1443_v13 = vmul.f32 %v2921_v10, %v1431_v12 }
 0x401   : > { %v2924_v11 = vsub.f32 %v1426_v20, %v1443_v13  ;;  %v2195_v20 = vld [vmem:[%s3128_s8 + $0x18] sm:$0xf0] }
 0x403   : > { %v1447_v29 = vmul.f32 %v2924_v11, %v2924_v11 }
 0x405   : > { %1449 = vadd.xlane.f32.xlu1 %v1447_v29  ;;  %v2372_v29 = vld [vmem:[%s3130_s10 + $0x30] sm:$0xff] }
 0x406   : > { %1768 = vmatpush.bf16.msra.mxu3 %v2372_v29 }
 0x407   : > { %v1435_v60 = vpop.xlane.xlu0 %1434 }
 0x408   : > { %v1444_v14 = vmul.f32 %v2921_v10, %v1435_v60  ;;  %v2380_v60 = vld [vmem:[%s3130_s10 + $0x70] sm:$0xff] }
 0x409   : > { %1782 = vmatpush.bf16.msra.mxu0 %v2380_v60 }
 0x40a   : > { %v2929_v15 = vsub.f32 %v1427_v57, %v1444_v14  ;;  %v2198_v57 = vor.u32 %v2352_v7, %v2195_v20  ;;  %1769 = vmatpush.bf16.msra.mxu3 %v2371_v19 }
 0x40c   : > { %v1448_v16 = vmul.f32 %v2929_v15, %v2929_v15  ;;  %1613 = vmatpush.bf16.msra.mxu2 %v2198_v57 }
 0x40d   : > { %1783 = vmatpush.bf16.msra.mxu0 %v2379_v21 }
 0x40e   : > { %v1451_v18 = vsel %vm1432_vm10, %v1448_v16, 0.0  ;;  %1770 = vmatpush.bf16.msra.mxu3 %v2370_v31 }
 0x40f   : > { %1452 = vadd.xlane.f32.xlu0 %v1451_v18 }
 0x410   : > { %1614 = vmatpush.bf16.msra.mxu2 %v2190_v56 }
 0x478   : > { %v1450_v4 = vpop.xlane.xlu1 %1449 }
 0x479   : > { %v1454_v59 = vmul.f32 %v1450_v4, %v2921_v10 }
 0x47b   : > { %v1456_v58 = vadd.f32 1e-05, %v1454_v59 }
 0x47d   : > { %2521 = vrsqrt.f32 %v1456_v58  ;;  %vm1464_vm13 = vweird.f32 %v1456_v58 }
 0x482   : > { %v1453_v8 = vpop.xlane.xlu0 %1452 }
 0x483   : > { %v2522_v12 = vpop.eup %2521  ;;  %v1455_v13 = vmul.f32 %v1453_v8, %v2921_v10 }
 0x484   : > { %v1459_v14 = vmul.f32 %v2522_v12, %v1456_v58  ;;  %vm1465_vm12 = vweird.f32 %v2522_v12 }
 0x485   : > { %v1457_v16 = vadd.f32 1e-05, %v1455_v13  ;;  %vm1466_vm14 = vmor %vm1464_vm13, %vm1465_vm12 }
 0x486   : > { %v1460_v18 = vmul.f32 %v2522_v12, %v1459_v14 }
 0x487   : > { %2523 = vrsqrt.f32 %v1457_v16  ;;  %vm1474_vm0 = vweird.f32 %v1457_v16 }
 0x488   : > { %v1461_v22 = vmul.f32 0.5, %v1460_v18 }
 0x48a   : > { %v1462_v23 = vsub.f32 1.5, %v1461_v22 }
 0x48c   : > { %v1463_v25 = vmul.f32 %v2522_v12, %v1462_v23 }
 0x48d   : > { %v2524_v24 = vpop.eup %2523 }
 0x48e   : > { %v1469_v42 = vmul.f32 %v2524_v24, %v1457_v16  ;;  %v1467_v27 = vsel %vm1466_vm14, %v2522_v12, %v1463_v25  ;;  %vm1475_vm15 = vweird.f32 %v2524_v24 }
 0x48f   : > { %v1478_v32 = vmul.f32 %v1467_v27, %v2924_v11  ;;  %vm1476_vm1 = vmor %vm1474_vm0, %vm1475_vm15  ;;  %v2369_v11 = vld [vmem:[%s3130_s10 + $0x18] sm:$0xff] }
 0x490   : > { %v1470_v26 = vmul.f32 %v2524_v24, %v1469_v42  ;;  %1771 = vmatpush.bf16.msra.mxu3 %v2369_v11 }
 0x491   : > { %v1483_v36 = vmul.f32 %v2450_v40, %v1478_v32 }
 0x492   : > { %v1471_v28 = vmul.f32 0.5, %v1470_v26 }
 0x493   : > { %v1488_v39 = vadd.f32 %v2451_v37, %v1483_v36 }
 0x494   : > { %v1472_v30 = vsub.f32 1.5, %v1471_v28  ;;  %1772 = vmatpush.bf16.msra.mxu3 %v2368_v44 }
 0x496   : > { %v1473_v33 = vmul.f32 %v2524_v24, %v1472_v30 }
 0x498   : > { %v1477_v34 = vsel %vm1476_vm1, %v2524_v24, %v1473_v33  ;;  %1773 = vmatpush.bf16.msra.mxu3 %v2367_v63 }
 0x499   : > { %v1479_v35 = vmul.f32 %v1477_v34, %v2929_v15  ;;  %v2378_v15 = vld [vmem:[%s3130_s10 + $0x60] sm:$0xff] }
 0x49a   : > { %1784 = vmatpush.bf16.msra.mxu0 %v2378_v15  ;;  %v2453_v15 = vld [vmem:[%s3132_s12] ss:$0 sm:$0xff] }
 0x49b   : > { %v1484_v38 = vmul.f32 %v2450_v40, %v1479_v35 }
 0x49c   : > { %1774 = vmatpush.bf16.msra.mxu3 %v2366_v46 }
 0x49d   : > { %v1489_v41 = vadd.f32 %v2451_v37, %v1484_v38 }
 0x49e   : > { %1785 = vmatpush.bf16.msra.mxu0 %v2377_v51 }
 0x49f   : > { %v1490_v43 = vpack.c.bf16 %v1489_v41, %v1488_v39 }
 0x4a1   : > { %1601 = vmatmul.bf16.vlgmr.msrb.gmra.mxu1 %v1490_v43  ;;  %1615 = vmatmul.bf16.vlgmr.msra.gmra.mxu2 %v1490_v43 }
 0x4a2   : > { %1786 = vmatpush.bf16.msra.mxu0 %v2376_v45 }
 0x4a6   : > { %1787 = vmatpush.bf16.msra.mxu0 %v2375_v47 }
 0x4aa   : > { %1788 = vmatpush.bf16.msra.mxu0 %v2374_v52 }
 0x51e   : > { %v1602_v17 = vpop.f32.mrf.mxu1 }
 0x51f   : > { %v1603_v50 = vadd.f32 %v1602_v17, %v1509_v48 }
 0x521   : > { %v1625_v59 = vmul.f32 0.01, %v1603_v50  ;;  %vm1621_vm2 = vcmp.ge.f32.partialorder %v1603_v50, 0.0 }
 0x523   : > { %v1629_v62 = vsel %vm1621_vm2, %v1603_v50, %v1625_v59 }
 0x524   : > { %v1616_v53 = vpop.f32.mrf.mxu2 }
 0x525   : > { %v1617_v61 = vadd.f32 %v1616_v53, %v1510_v55 }
 0x526   : > { %v1604_v4 = vpop.f32.mrf.mxu1 }
 0x527   : > { %v1605_v9 = vadd.f32 %v1604_v4, %v1509_v48  ;;  %v1626_v58 = vmul.f32 0.01, %v1617_v61  ;;  %vm1622_vm4 = vcmp.ge.f32.partialorder %v1617_v61, 0.0 }
 0x529   : > { %vm1623_vm3 = vcmp.ge.f32.partialorder %v1605_v9, 0.0  ;;  %v1627_v7 = vmul.f32 0.01, %v1605_v9  ;;  %v1630_v2 = vsel %vm1622_vm4, %v1617_v61, %v1626_v58 }
 0x52b   : > { %v1631_v20 = vsel %vm1623_vm3, %v1605_v9, %v1627_v7 }
 0x52c   : > { %v1633_v54 = vpack.c.bf16 %v1631_v20, %v1629_v62  ;;  %v1618_v0 = vpop.f32.mrf.mxu2 }
 0x52d   : > { %v1619_v57 = vadd.f32 %v1618_v0, %v1510_v55 }
 0x52e   : > { %1775 = vmatmul.bf16.vlgmr.msra.gmra.mxu3 %v1633_v54 }
 0x52f   : > { %vm1624_vm5 = vcmp.ge.f32.partialorder %v1619_v57, 0.0  ;;  %v1628_v1 = vmul.f32 0.01, %v1619_v57 }
 0x531   : > { %v1632_v3 = vsel %vm1624_vm5, %v1619_v57, %v1628_v1 }
 0x532   : > { %v1634_v56 = vpack.c.bf16 %v1632_v3, %v1630_v2 }
 0x534   : > { %1789 = vmatmul.bf16.vlgmr.msra.gmra.mxu0 %v1634_v56 }
 0x5b1   : > { %v1776_v6 = vpop.f32.mrf.mxu3  ;;  %v1790_v8 = vpop.f32.mrf.mxu0 }
 0x5b2   : > { %v1777_v12 = vadd.f32 %v2452_v5, %v1776_v6 }
 0x5b4   : > { %v1791_v13 = vadd.f32 %v1790_v8, %v1777_v12 }
 0x5b6   : > { %v1795_v29 = vadd.f32 %v1791_v13, %v1488_v39 }
 0x5b8   : > { %1799 = vadd.xlane.f32.xlu1 %v1795_v29 }
 0x5b9   : > { %v1778_v60 = vpop.f32.mrf.mxu3  ;;  %v1792_v16 = vpop.f32.mrf.mxu0 }
 0x5ba   : > { %v1779_v14 = vadd.f32 %v2452_v5, %v1778_v60 }
 0x5bc   : > { %v1793_v18 = vadd.f32 %v1792_v16, %v1779_v14 }
 0x5be   : > { %v1796_v19 = vadd.f32 %v1793_v18, %v1489_v41 }
 0x5c0   : > { %v1801_v21 = vsel %vm1432_vm10, %v1796_v19, 0.0 }
 0x5c1   : > { %1802 = vadd.xlane.f32.xlu2 %v1801_v21 }
 0x62b   : > { %v1800_v22 = vpop.xlane.xlu1 %1799 }
 0x62c   : > { %v1804_v23 = vmul.f32 %v1800_v22, %v2921_v10 }
 0x62e   : > { %v1806_v31 = vsub.f32 %v1795_v29, %v1804_v23 }
 0x630   : > { %v1808_v24 = vmul.f32 %v1806_v31, %v1806_v31 }
 0x632   : > { %1810 = vadd.xlane.f32.xlu0 %v1808_v24 }
 0x634   : > { %v1803_v25 = vpop.xlane.xlu2 %1802 }
 0x635   : > { %v1805_v42 = vmul.f32 %v1803_v25, %v2921_v10 }
 0x637   : > { %v1807_v26 = vsub.f32 %v1796_v19, %v1805_v42 }
 0x639   : > { %v1809_v27 = vmul.f32 %v1807_v26, %v1807_v26 }
 0x63b   : > { %v1812_v28 = vsel %vm1432_vm10, %v1809_v27, 0.0 }
 0x63c   : > { %1813 = vadd.xlane.f32.xlu2 %v1812_v28 }
 0x6a5   : > { %v1811_v30 = vpop.xlane.xlu0 %1810 }
 0x6a6   : > { %v1815_v32 = vmul.f32 %v1811_v30, %v2921_v10 }
 0x6a8   : > { %v1817_v40 = vadd.f32 1e-05, %v1815_v32 }
 0x6aa   : > { %2525 = vrsqrt.f32 %v1817_v40  ;;  %vm1825_vm7 = vweird.f32 %v1817_v40 }
 0x6af   : > { %v1814_v33 = vpop.xlane.xlu2 %1813 }
 0x6b0   : > { %v2526_v34 = vpop.eup %2525  ;;  %v1816_v35 = vmul.f32 %v1814_v33, %v2921_v10  ;;  %v2454_v10 = vld [vmem:[%s3133_s13] ss:$0 sm:$0xff] }
 0x6b1   : > { %v1820_v36 = vmul.f32 %v2526_v34, %v1817_v40  ;;  %vm1826_vm6 = vweird.f32 %v2526_v34 }
 0x6b2   : > { %v1818_v37 = vadd.f32 1e-05, %v1816_v35  ;;  %vm1827_vm8 = vmor %vm1825_vm7, %vm1826_vm6 }
 0x6b3   : > { %v1821_v38 = vmul.f32 %v2526_v34, %v1820_v36 }
 0x6b4   : > { %2527 = vrsqrt.f32 %v1818_v37  ;;  %vm1835_vm10 = vweird.f32 %v1818_v37 }
 0x6b5   : > { %v1822_v39 = vmul.f32 0.5, %v1821_v38 }
 0x6b7   : > { %v1823_v41 = vsub.f32 1.5, %v1822_v39 }
 0x6b9   : > { %v1824_v43 = vmul.f32 %v2526_v34, %v1823_v41 }
 0x6ba   : > { %v2528_v11 = vpop.eup %2527 }
 0x6bb   : > { %v1828_v44 = vsel %vm1827_vm8, %v2526_v34, %v1824_v43  ;;  %v1830_v51 = vmul.f32 %v2528_v11, %v1818_v37  ;;  %vm1836_vm9 = vweird.f32 %v2528_v11 }
 0x6bc   : > { %v1839_v63 = vmul.f32 %v1828_v44, %v1806_v31  ;;  %vm1837_vm11 = vmor %vm1835_vm10, %vm1836_vm9 }
 0x6bd   : > { %v1831_v45 = vmul.f32 %v2528_v11, %v1830_v51 }
 0x6be   : > { %v1844_v46 = vmul.f32 %v2453_v15, %v1839_v63 }
 0x6bf   : > { %v1832_v47 = vmul.f32 0.5, %v1831_v45 }
 0x6c0   : > { %v1849_v52 = vadd.f32 %v2454_v10, %v1844_v46 }
 0x6c1   : > { %v1833_v49 = vsub.f32 1.5, %v1832_v47 }
 0x6c2   : > { %1851 = vst [vmem:[%s581_s20] sm:$0xff] %v1849_v52 }
 0x6c3   : > { %v1834_v17 = vmul.f32 %v2528_v11, %v1833_v49 }
 0x6c5   : > { %v1838_v48 = vsel %vm1837_vm11, %v2528_v11, %v1834_v17 }
 0x6c6   : > { %v1840_v50 = vmul.f32 %v1838_v48, %v1807_v26 }
 0x6c8   : > { %v1845_v53 = vmul.f32 %v2453_v15, %v1840_v50 }
 0x6ca   : > { %v1850_v55 = vadd.f32 %v2454_v10, %v1845_v53 }
 0x6cc   : > { %1852 = vst [vmem:[%s581_s20 + $0x8] sm:$0xf] %v1850_v55 }
 0x6cd PF: > { %s24_s15 = sadd.s32 1, %s2551_s15   ;;  %s3135_s29 = smov %s2547_s30 }
 0x6ce   : > { %p21_p5 = scmp.ge.s32.totalorder %s24_s15, 4   ;;  %s3136_s30 = smov %s3138_s16 }
 0x6d0   :  { %23 = sbr.rel (!%p21_p5) target bundleno = 2 (0x2), region = 136 }

</bundles_post_ra>
